<compile_context>
chip_gen: v5e
topology: v5e:2x2
jax: 0.10.0
libtpu: 0.0.40
codegen_flags: <defaults>
</compile_context>

<pallas_src>
import jax
import jax.numpy as jnp
from jax.experimental import pallas as pl
from jax.experimental.pallas import tpu as pltpu

NUM_CLASSES = 10
C_IN = 768     # conv in_channels
C_OUT = 100    # conv out_channels
PAD = 128      # lane-aligned padded width per conv output position / FC output
N_TAPS = 4     # conv1 tap, conv2 tapA, conv3 tap, conv2 tapB


def textcnn_kernel(x_ref, wtaps_ref, btaps_ref, fcw_ref, fcb_ref, out_ref):
    # f32 rows from HBM, cast to bf16 on the VPU (no wrapper-side cast pass).
    x = x_ref[...].astype(jnp.bfloat16)                         # (TB, 768) bf16
    # Every conv output position of all three convs in one MXU matmul, f32 acc,
    # then bias + ReLU.  Kept as a value: no scratch store/reload.
    h = jnp.maximum(
        jnp.dot(x, wtaps_ref[...], preferred_element_type=jnp.float32)
        + btaps_ref[...], 0.0)                                  # (TB, 4*PAD) f32
    # max_pool1d for conv2: its two output positions live in lane blocks 1 and 3.
    # ReLU is monotone, so max of the ReLU'd taps == pool(relu(conv2)).
    p2 = jnp.maximum(h[:, PAD:2 * PAD], h[:, 3 * PAD:4 * PAD])  # (TB, PAD) f32
    # dropout is identity in eval mode.  FC as a sum of three K=128 bf16 dots on
    # 128-lane-aligned slices (same MXU work as one K=384 dot, no concatenate).
    fcw = fcw_ref[...]                                          # (3*PAD, PAD) bf16
    out_ref[...] = (
        jnp.dot(h[:, :PAD].astype(jnp.bfloat16), fcw[:PAD],
                preferred_element_type=jnp.float32)
        + jnp.dot(p2.astype(jnp.bfloat16), fcw[PAD:2 * PAD],
                  preferred_element_type=jnp.float32)
        + jnp.dot(h[:, 2 * PAD:3 * PAD].astype(jnp.bfloat16), fcw[2 * PAD:],
                  preferred_element_type=jnp.float32)
        + fcb_ref[...])                                         # (TB, PAD) f32


def build_params(key, num_classes=NUM_CLASSES):
    """Deterministic synthetic parameters matching the nn.Module shapes."""
    k = jax.random.split(key, 8)
    w1 = jax.random.normal(k[0], (C_OUT, C_IN, 3), jnp.float32) * 0.02
    b1 = jax.random.normal(k[1], (C_OUT,), jnp.float32) * 0.02
    w2 = jax.random.normal(k[2], (C_OUT, C_IN, 4), jnp.float32) * 0.02
    b2 = jax.random.normal(k[3], (C_OUT,), jnp.float32) * 0.02
    w3 = jax.random.normal(k[4], (C_OUT, C_IN, 5), jnp.float32) * 0.02
    b3 = jax.random.normal(k[5], (C_OUT,), jnp.float32) * 0.02
    fcw = jax.random.normal(k[6], (num_classes, 3 * C_OUT), jnp.float32) * 0.02
    fcb = jax.random.normal(k[7], (num_classes,), jnp.float32) * 0.02
    return (w1, b1, w2, b2, w3, b3, fcw, fcb)


def pack_params(params, compute_dtype=jnp.bfloat16):
    """Glue: build lane-padded weight slabs in the order the kernel expects."""
    w1, b1, w2, b2, w3, b3, fcw, fcb = params
    num_classes = fcw.shape[0]

    def tap_t(w, t):  # (O, C, K) -> (C_IN, PAD), zero-padded on the lane axis
        return jnp.pad(w[:, :, t].T, ((0, 0), (0, PAD - C_OUT)))

    # Taps overlapping the single real element of the length-1 padded sequence:
    #   conv1 (k=3, p=1): out pos 0 -> tap 1
    #   conv2 (k=4, p=2): out pos 0 -> tap 2, out pos 1 -> tap 1
    #   conv3 (k=5, p=2): out pos 0 -> tap 2
    # Block order [conv1, conv2_posA, conv3, conv2_posB]: pooled features are the
    # first three blocks after max-ing blocks 1 and 3.
    wtaps = jnp.concatenate(
        [tap_t(w1, 1), tap_t(w2, 2), tap_t(w3, 2), tap_t(w2, 1)],
        axis=1).astype(compute_dtype)                          # (768, 4*PAD) bf16

    def bpad(b):
        return jnp.pad(b, (0, PAD - C_OUT))

    btaps = jnp.concatenate(
        [bpad(b1), bpad(b2), bpad(b3), bpad(b2)])[None, :]     # (1, 4*PAD) f32

    # fc.weight (num_classes, 300) -> (3*PAD, PAD): row blocks [conv1, conv2, conv3]
    # zero-padded to 128 rows each, output lanes zero-padded to 128 (lane-dense out).
    fcwt = fcw.T                                               # (300, num_classes)
    blocks = [jnp.pad(fcwt[i * C_OUT:(i + 1) * C_OUT],
                      ((0, PAD - C_OUT), (0, 0))) for i in range(3)]
    fcw_pad = jnp.concatenate(blocks, axis=0)                  # (3*PAD, num_classes)
    fcw_pad = jnp.pad(fcw_pad,
                      ((0, 0), (0, PAD - num_classes))).astype(compute_dtype)
    fcb_row = jnp.pad(fcb, (0, PAD - num_classes))[None, :]    # (1, PAD) f32
    return wtaps, btaps, fcw_pad, fcb_row


def _round_up(a, m):
    return (a + m - 1) // m * m


def textcnn_forward(x, wtaps, btaps, fcw_pad, fcb_row,
                    num_classes=NUM_CLASSES, block_b=1024):
    B = x.shape[0]
    # Batch tile: multiple of the sublane granule (16 covers f32 & bf16), capped at
    # block_b, and at most ceil(B/2) so any B > 16 gives >= 2 grid steps (lets the
    # "parallel" axis shard across v7x's two TensorCores).
    TB = min(block_b, _round_up((B + 1) // 2, 16))
    B_pad = _round_up(B, TB)
    xp = x if B_pad == B else jnp.pad(x, ((0, B_pad - B), (0, 0)))

    resident = dict(pipeline_mode=pl.Buffered(buffer_count=1))  # grid-invariant weights

    out = pl.pallas_call(
        textcnn_kernel,
        out_shape=jax.ShapeDtypeStruct((B_pad, PAD), jnp.float32),
        grid_spec=pltpu.PrefetchScalarGridSpec(
            num_scalar_prefetch=0,
            grid=(B_pad // TB,),
            in_specs=[
                pl.BlockSpec((TB, C_IN), lambda i: (i, 0)),            # x: tiled over B
                pl.BlockSpec(wtaps.shape, lambda i: (0, 0), **resident),
                pl.BlockSpec(btaps.shape, lambda i: (0, 0), **resident),
                pl.BlockSpec(fcw_pad.shape, lambda i: (0, 0), **resident),
                pl.BlockSpec(fcb_row.shape, lambda i: (0, 0), **resident),
            ],
            out_specs=pl.BlockSpec((TB, PAD), lambda i: (i, 0)),       # lane-dense out
        ),
        compiler_params=pltpu.CompilerParams(
            dimension_semantics=("parallel",),        # shards over v7x's 2 TCs
            vmem_limit_bytes=32 * 1024 * 1024),       # ample for TB<=2048 everywhere
    )(xp, wtaps, btaps, fcw_pad, fcb_row)
    return out[:B, :num_classes]


def reference_forward(x, params):
    """Pure-JAX f32 reference reproducing the PyTorch forward (eval mode)."""
    w1, b1, w2, b2, w3, b3, fcw, fcb = params
    xc = x[:, :, None]  # (B, 768, 1)  == x.unsqueeze(1).permute(0, 2, 1)

    def conv_relu_pool(w, b, pad):
        y = jax.lax.conv_general_dilated(
            xc, w, window_strides=(1,), padding=[(pad, pad)],
            dimension_numbers=('NCH', 'OIH', 'NCH'))
        y = jax.nn.relu(y + b[None, :, None])
        return jnp.max(y, axis=2)        # max_pool1d over full length + squeeze

    p1 = conv_relu_pool(w1, b1, 1)
    p2 = conv_relu_pool(w2, b2, 2)
    p3 = conv_relu_pool(w3, b3, 2)
    feat = jnp.concatenate([p1, p2, p3], axis=1)   # (B, 300); dropout == identity (eval)
    return feat @ fcw.T + fcb


if __name__ == "__main__":
    key = jax.random.PRNGKey(0)
    kx, kp = jax.random.split(key)

    B = 2
    x = jax.random.normal(kx, (B, C_IN), jnp.float32)

    params = build_params(kp, NUM_CLASSES)
    wtaps, btaps, fcw_pad, fcb_row = pack_params(params)

    out = textcnn_forward(x, wtaps, btaps, fcw_pad, fcb_row)
    out = jax.block_until_ready(out)

    ref = reference_forward(x, params)
    assert out.shape == (B, NUM_CLASSES)
    # bf16 activations/weights with f32 accumulation vs. f32 reference.
    assert jnp.allclose(out, ref, atol=2e-2, rtol=2e-2), (out, ref)

    print("KERNEL_OK")
</pallas_src>

<mosaic_0001>
module attributes {stable_mosaic.version = 11 : i64} {
  func.func @textcnn_kernel(%arg0: i32, %arg1: memref<16x768xf32, #tpu.memory_space<vmem>>, %arg2: memref<768x512xbf16, #tpu.memory_space<vmem>>, %arg3: memref<1x512xf32, #tpu.memory_space<vmem>>, %arg4: memref<384x128xbf16, #tpu.memory_space<vmem>>, %arg5: memref<1x128xf32, #tpu.memory_space<vmem>>, %arg6: memref<16x128xf32, #tpu.memory_space<vmem>>) attributes {dimension_semantics = [#tpu.dimension_semantics<parallel>], iteration_bounds = array<i64: 1>, scalar_prefetch = 0 : i64, scratch_operands = 0 : i64, tpu.core_type = #tpu.core_type<tc>, window_params = [{transform_indices = @transform_0, window_bounds = array<i64: 16, 768>}, {pipeline_mode = #tpu.pipeline_mode<synchronous>, transform_indices = @transform_1, window_bounds = array<i64: 768, 512>}, {pipeline_mode = #tpu.pipeline_mode<synchronous>, transform_indices = @transform_2, window_bounds = array<i64: 1, 512>}, {pipeline_mode = #tpu.pipeline_mode<synchronous>, transform_indices = @transform_3, window_bounds = array<i64: 384, 128>}, {pipeline_mode = #tpu.pipeline_mode<synchronous>, transform_indices = @transform_4, window_bounds = array<i64: 1, 128>}, {transform_indices = @transform_5, window_bounds = array<i64: 16, 128>}]} {
    %c0 = arith.constant 0 : index
    %c0_0 = arith.constant 0 : index
    %0 = vector.load %arg1[%c0, %c0_0] : memref<16x768xf32, #tpu.memory_space<vmem>>, vector<16x768xf32>
    %1 = arith.truncf %0 : vector<16x768xf32> to vector<16x768xbf16>
    %c0_1 = arith.constant 0 : index
    %c0_2 = arith.constant 0 : index
    %2 = vector.load %arg2[%c0_1, %c0_2] : memref<768x512xbf16, #tpu.memory_space<vmem>>, vector<768x512xbf16>
    %cst = arith.constant dense<0.000000e+00> : vector<16x512xf32>
    %3 = tpu.matmul %1, %2, %cst {dimension_numbers = #tpu.dot_dimension_numbers<[1], [0], [0], [1], [0, 0, 1, 1], [], []>} : vector<16x768xbf16>, vector<768x512xbf16>, vector<16x512xf32> -> vector<16x512xf32>
    %c0_3 = arith.constant 0 : index
    %c0_4 = arith.constant 0 : index
    %4 = vector.load %arg3[%c0_3, %c0_4] : memref<1x512xf32, #tpu.memory_space<vmem>>, vector<1x512xf32>
    %5 = vector.broadcast %4 : vector<1x512xf32> to vector<16x512xf32>
    %6 = arith.addf %3, %5 : vector<16x512xf32>
    %cst_5 = arith.constant 0.000000e+00 : f32
    %7 = vector.broadcast %cst_5 : f32 to vector<16x512xf32>
    %8 = arith.maximumf %6, %7 : vector<16x512xf32>
    %9 = vector.extract_strided_slice %8 {offsets = [0, 128], sizes = [16, 128], strides = [1, 1]} : vector<16x512xf32> to vector<16x128xf32>
    %10 = vector.extract_strided_slice %8 {offsets = [0, 384], sizes = [16, 128], strides = [1, 1]} : vector<16x512xf32> to vector<16x128xf32>
    %11 = arith.maximumf %9, %10 : vector<16x128xf32>
    %c0_6 = arith.constant 0 : index
    %c0_7 = arith.constant 0 : index
    %12 = vector.load %arg4[%c0_6, %c0_7] : memref<384x128xbf16, #tpu.memory_space<vmem>>, vector<384x128xbf16>
    %13 = vector.extract_strided_slice %8 {offsets = [0, 0], sizes = [16, 128], strides = [1, 1]} : vector<16x512xf32> to vector<16x128xf32>
    %14 = arith.truncf %13 : vector<16x128xf32> to vector<16x128xbf16>
    %15 = vector.extract_strided_slice %12 {offsets = [0, 0], sizes = [128, 128], strides = [1, 1]} : vector<384x128xbf16> to vector<128x128xbf16>
    %cst_8 = arith.constant dense<0.000000e+00> : vector<16x128xf32>
    %16 = tpu.matmul %14, %15, %cst_8 {dimension_numbers = #tpu.dot_dimension_numbers<[1], [0], [0], [1], [0, 0, 1, 1], [], []>} : vector<16x128xbf16>, vector<128x128xbf16>, vector<16x128xf32> -> vector<16x128xf32>
    %17 = arith.truncf %11 : vector<16x128xf32> to vector<16x128xbf16>
    %18 = vector.extract_strided_slice %12 {offsets = [128, 0], sizes = [128, 128], strides = [1, 1]} : vector<384x128xbf16> to vector<128x128xbf16>
    %cst_9 = arith.constant dense<0.000000e+00> : vector<16x128xf32>
    %19 = tpu.matmul %17, %18, %cst_9 {dimension_numbers = #tpu.dot_dimension_numbers<[1], [0], [0], [1], [0, 0, 1, 1], [], []>} : vector<16x128xbf16>, vector<128x128xbf16>, vector<16x128xf32> -> vector<16x128xf32>
    %20 = arith.addf %16, %19 : vector<16x128xf32>
    %21 = vector.extract_strided_slice %8 {offsets = [0, 256], sizes = [16, 128], strides = [1, 1]} : vector<16x512xf32> to vector<16x128xf32>
    %22 = arith.truncf %21 : vector<16x128xf32> to vector<16x128xbf16>
    %23 = vector.extract_strided_slice %12 {offsets = [256, 0], sizes = [128, 128], strides = [1, 1]} : vector<384x128xbf16> to vector<128x128xbf16>
    %cst_10 = arith.constant dense<0.000000e+00> : vector<16x128xf32>
    %24 = tpu.matmul %22, %23, %cst_10 {dimension_numbers = #tpu.dot_dimension_numbers<[1], [0], [0], [1], [0, 0, 1, 1], [], []>} : vector<16x128xbf16>, vector<128x128xbf16>, vector<16x128xf32> -> vector<16x128xf32>
    %25 = arith.addf %20, %24 : vector<16x128xf32>
    %c0_11 = arith.constant 0 : index
    %c0_12 = arith.constant 0 : index
    %26 = vector.load %arg5[%c0_11, %c0_12] : memref<1x128xf32, #tpu.memory_space<vmem>>, vector<1x128xf32>
    %27 = vector.broadcast %26 : vector<1x128xf32> to vector<16x128xf32>
    %28 = arith.addf %25, %27 : vector<16x128xf32>
    %c0_13 = arith.constant 0 : index
    %c0_14 = arith.constant 0 : index
    %29 = vector.load %arg6[%c0_13, %c0_14] : memref<16x128xf32, #tpu.memory_space<vmem>>, vector<16x128xf32>
    tpu.vector_store %arg6[%c0_13, %c0_14], %28 {strides = array<i32>} : memref<16x128xf32, #tpu.memory_space<vmem>>, vector<16x128xf32>,
    return
  }
  func.func @transform_0(%arg0: i32) -> (i32, i32) {
    %c0_i32 = arith.constant 0 : i32
    %c0_i32_0 = arith.constant 0 : i32
    return %arg0, %c0_i32 : i32, i32
  }
  func.func @transform_1(%arg0: i32) -> (i32, i32) {
    %c0_i32 = arith.constant 0 : i32
    %c0_i32_0 = arith.constant 0 : i32
    %c0_i32_1 = arith.constant 0 : i32
    return %c0_i32, %c0_i32_0 : i32, i32
  }
  func.func @transform_2(%arg0: i32) -> (i32, i32) {
    %c0_i32 = arith.constant 0 : i32
    %c0_i32_0 = arith.constant 0 : i32
    %c0_i32_1 = arith.constant 0 : i32
    return %c0_i32, %c0_i32_0 : i32, i32
  }
  func.func @transform_3(%arg0: i32) -> (i32, i32) {
    %c0_i32 = arith.constant 0 : i32
    %c0_i32_0 = arith.constant 0 : i32
    %c0_i32_1 = arith.constant 0 : i32
    return %c0_i32, %c0_i32_0 : i32, i32
  }
  func.func @transform_4(%arg0: i32) -> (i32, i32) {
    %c0_i32 = arith.constant 0 : i32
    %c0_i32_0 = arith.constant 0 : i32
    %c0_i32_1 = arith.constant 0 : i32
    return %c0_i32, %c0_i32_0 : i32, i32
  }
  func.func @transform_5(%arg0: i32) -> (i32, i32) {
    %c0_i32 = arith.constant 0 : i32
    %c0_i32_0 = arith.constant 0 : i32
    return %arg0, %c0_i32 : i32, i32
  }
}

</mosaic_0001>

<bundles_post_ra>
// kernel: tpu_custom_call.1
= control target key start
LH: loop header
LB: loop body
LE: loop exit
PB: predicated region body
PF: predicated region fallthrough
CT: control target
= control target key end

     0   :  { %10 = vsyncpa [#allocation3], 0  ;;  %s3213_s0 = inlined_call_operand.hbm [shape: f32[16,768], index: 0, kind: input, shape index: {}]   ;;  %s3214_s1 = inlined_call_operand.hbm [shape: bf16[768,512], index: 1, kind: input, shape index: {}]   ;;  %s3215_s2 = inlined_call_operand.hbm [shape: f32[1,512], index: 2, kind: input, shape index: {}]   ;;  %s3216_s3 = inlined_call_operand.hbm [shape: bf16[384,128], index: 3, kind: input, shape index: {}]   ;;  %s3217_s4 = inlined_call_operand.vmem [shape: f32[1,128], index: 4, kind: input, shape index: {}]   ;;  %s3218_s5 = inlined_call_operand.hbm [shape: f32[16,128], index: 5, kind: output, shape index: {}]  }
   0x1   :  { %11 = vsyncpa [#allocation6], 0 }
   0x2   :  { %12 = vsyncpa [#allocation9], 0  ;;  %s31_s20 = sshll.u32 %s3214_s1, 4  ;;  %s32_s20 = int_to_ptr.hbm [resolvable:$true] %s31_s20 }
   0x3   :  { %13 = vsyncpa [#allocation4], 0  ;;  %s3098_s21 = smov [#allocation5]   ;;  %s18_s25 = sshll.u32 %s3213_s0, 4  ;;  %s19_s25 = int_to_ptr.hbm [resolvable:$true] %s18_s25 }
   0x4   :  { %s33_s22 = sshll.u32 %s3098_s21, 4  ;;  %s3099_s26 = smov 256   ;;  %s34_s22 = int_to_ptr.vmem [resolvable:$true] %s33_s22 }
   0x5   :  { %s3100_s27 = smov 16   ;;  %s3101_s28 = smov [#allocation2]  }
   0x6   :  { %39 = dma.hbm_to_vmem [thread:$0]  %s32_s20, 24576, %s34_s22, [#allocation6], %s3099_s26, %s3099_s26, %s3100_s27  }
   0x7   :  { %s20_s29 = sshll.u32 %s3101_s28, 4  ;;  %s3102_s30 = smov 768   ;;  %s21_s29 = int_to_ptr.vmem [resolvable:$true] %s20_s29 }
   0x8   :  { %s3103_s6 = smov 48   ;;  %s45_s8 = sshll.u32 %s3215_s2, 4  ;;  %s46_s8 = int_to_ptr.hbm [resolvable:$true] %s45_s8 }
   0x9   :  { %26 = dma.hbm_to_vmem [thread:$0]  %s19_s25, 1536, %s21_s29, [#allocation3], %s3102_s30, %s3102_s30, %s3103_s6  }
   0xa   :  { %s3104_s9 = smov [#allocation7]   ;;  %s55_s12 = sshll.u32 %s3216_s3, 4  ;;  %s56_s12 = int_to_ptr.hbm [resolvable:$true] %s55_s12 }
   0xb   :  { %s47_s10 = sshll.u32 %s3104_s9, 4  ;;  %s3105_s13 = smov [#allocation8]   ;;  %s48_s10 = int_to_ptr.vmem [resolvable:$true] %s47_s10 }
   0xc   :  { %50 = dma.hbm_to_vmem [thread:$0]  %s46_s8, 64, %s48_s10, [#allocation6]  }
   0xd   :  { %s57_s14 = sshll.u32 %s3105_s13, 4  ;;  %s3106_s15 = smov 64   ;;  %s58_s14 = int_to_ptr.vmem [resolvable:$true] %s57_s14 }
   0xe   :  { %s3107_s16 = smov 4  }
   0xf   :  { %63 = dma.hbm_to_vmem [thread:$0]  %s56_s12, 3072, %s58_s14, [#allocation9], %s3106_s15, %s3106_s15, %s3107_s16  }
  0x10   :  { %3090 = dma.done.wait [#allocation3], 1536  }
  0x11   :  { %3091 = vsyncadd [#allocation3], 4294965760 }
  0x12   :  { %3092 = dma.done.wait [#allocation6], 24640  }
  0x13   :  { %3093 = vsyncadd [#allocation6], 4294942656 }
  0x14   :  { %3094 = dma.done.wait [#allocation9], 3072  }
  0x15   :  { %3095 = vsyncadd [#allocation9], 4294964224  ;;  %v1990_v0 = vld [vmem:[#allocation5 + $0xe0] sm:$0xf]  ;;  %v2770_v1 = vld [vmem:[#allocation5 + $0xec] sm:$0xf0] }
  0x16   :  { %v2118_v2 = vld [vmem:[#allocation5 + $0x1e0] sm:$0xf]  ;;  %v1991_v3 = vor.u32 %v2770_v1, %v1990_v0  ;;  %v2802_v4 = vld [vmem:[#allocation5 + $0x1ec] sm:$0xf0]  ;;  %s3108_s17 = smov [#allocation10]   ;;  %s1861_s21 = sshll.u32 %s3218_s5, 4  ;;  %s1862_s21 = int_to_ptr.hbm [resolvable:$true] %s1861_s21 }
  0x17   :  { %v2246_v5 = vld [vmem:[#allocation5 + $0x2e0] sm:$0xf]  ;;  %v2834_v6 = vld [vmem:[#allocation5 + $0x2ec] sm:$0xf0]  ;;  %v2119_v7 = vor.u32 %v2802_v4, %v2118_v2  ;;  %s1859_s18 = sshll.u32 %s3108_s17, 4  ;;  %s3109_s22 = smov 128   ;;  %s1860_s18 = int_to_ptr.vmem [resolvable:$true] %s1859_s18 }
  0x18   :  { %v2247_v8 = vor.u32 %v2834_v6, %v2246_v5  ;;  %v2374_v9 = vld [vmem:[#allocation5 + $0x3e0] sm:$0xf]  ;;  %v2866_v10 = vld [vmem:[#allocation5 + $0x3ec] sm:$0xf0]  ;;  %1262 = vmatpush.bf16.msra.mxu0 %v1991_v3 }
  0x19   :  { %v1974_v11 = vld [vmem:[#allocation5 + $0xc0] sm:$0xf]  ;;  %v2375_v12 = vor.u32 %v2866_v10, %v2374_v9  ;;  %v2766_v13 = vld [vmem:[#allocation5 + $0xcc] sm:$0xf0]  ;;  %1276 = vmatpush.bf16.msra.mxu1 %v2119_v7 }
  0x1a   :  { %v2102_v14 = vld [vmem:[#allocation5 + $0x1c0] sm:$0xf]  ;;  %v2798_v15 = vld [vmem:[#allocation5 + $0x1cc] sm:$0xf0]  ;;  %1290 = vmatpush.bf16.msra.mxu2 %v2247_v8  ;;  %v1975_v16 = vor.u32 %v2766_v13, %v1974_v11 }
  0x1b   :  { %v2103_v17 = vor.u32 %v2798_v15, %v2102_v14  ;;  %v2230_v18 = vld [vmem:[#allocation5 + $0x2c0] sm:$0xf]  ;;  %v2830_v19 = vld [vmem:[#allocation5 + $0x2cc] sm:$0xf0]  ;;  %1304 = vmatpush.bf16.msra.mxu3 %v2375_v12 }
  0x1c   :  { %v2358_v20 = vld [vmem:[#allocation5 + $0x3c0] sm:$0xf]  ;;  %v2231_v21 = vor.u32 %v2830_v19, %v2230_v18  ;;  %v2862_v22 = vld [vmem:[#allocation5 + $0x3cc] sm:$0xf0]  ;;  %1263 = vmatpush.bf16.msra.mxu0 %v1975_v16 }
  0x1d   :  { %v1958_v23 = vld [vmem:[#allocation5 + $0xa0] sm:$0xf]  ;;  %v2762_v24 = vld [vmem:[#allocation5 + $0xac] sm:$0xf0]  ;;  %v2359_v25 = vor.u32 %v2862_v22, %v2358_v20  ;;  %1277 = vmatpush.bf16.msra.mxu1 %v2103_v17 }
  0x1e   :  { %v2086_v26 = vld [vmem:[#allocation5 + $0x1a0] sm:$0xf]  ;;  %v2794_v27 = vld [vmem:[#allocation5 + $0x1ac] sm:$0xf0]  ;;  %v1959_v29 = vor.u32 %v2762_v24, %v1958_v23  ;;  %1291 = vmatpush.bf16.msra.mxu2 %v2231_v21 }
  0x1f   :  { %v2214_v28 = vld [vmem:[#allocation5 + $0x2a0] sm:$0xf]  ;;  %v2826_v30 = vld [vmem:[#allocation5 + $0x2ac] sm:$0xf0]  ;;  %v2087_v33 = vor.u32 %v2794_v27, %v2086_v26  ;;  %1305 = vmatpush.bf16.msra.mxu3 %v2359_v25 }
  0x20   :  { %v2342_v31 = vld [vmem:[#allocation5 + $0x3a0] sm:$0xf]  ;;  %v2858_v32 = vld [vmem:[#allocation5 + $0x3ac] sm:$0xf0]  ;;  %v2215_v34 = vor.u32 %v2826_v30, %v2214_v28  ;;  %1264 = vmatpush.bf16.msra.mxu0 %v1959_v29 }
  0x21   :  { %v1942_v35 = vld [vmem:[#allocation5 + $0x80] sm:$0xf]  ;;  %v2758_v36 = vld [vmem:[#allocation5 + $0x8c] sm:$0xf0]  ;;  %v2343_v38 = vor.u32 %v2858_v32, %v2342_v31  ;;  %1278 = vmatpush.bf16.msra.mxu1 %v2087_v33  ;;  %v2768_v33 = vld [vmem:[#allocation5 + $0xe4] sm:$0xf] }
  0x22   :  { %v2070_v37 = vld [vmem:[#allocation5 + $0x180] sm:$0xf]  ;;  %v2790_v39 = vld [vmem:[#allocation5 + $0x18c] sm:$0xf0]  ;;  %v1943_v44 = vor.u32 %v2758_v36, %v1942_v35  ;;  %1292 = vmatpush.bf16.msra.mxu2 %v2215_v34  ;;  %v1992_v34 = vld [vmem:[#allocation5 + $0xf0] sm:$0xf0] }
  0x23   :  { %v2198_v40 = vld [vmem:[#allocation5 + $0x280] sm:$0xf]  ;;  %v2822_v41 = vld [vmem:[#allocation5 + $0x28c] sm:$0xf0]  ;;  %v2071_v45 = vor.u32 %v2790_v39, %v2070_v37  ;;  %1306 = vmatpush.bf16.msra.mxu3 %v2343_v38  ;;  %v2800_v37 = vld [vmem:[#allocation5 + $0x1e4] sm:$0xf] }
  0x24   :  { %v2326_v42 = vld [vmem:[#allocation5 + $0x380] sm:$0xf]  ;;  %v2854_v43 = vld [vmem:[#allocation5 + $0x38c] sm:$0xf0]  ;;  %v2199_v46 = vor.u32 %v2822_v41, %v2198_v40  ;;  %1265 = vmatpush.bf16.msra.mxu0 %v1943_v44  ;;  %v2120_v38 = vld [vmem:[#allocation5 + $0x1f0] sm:$0xf0] }
  0x25   :  { %v1926_v47 = vld [vmem:[#allocation5 + $0x60] sm:$0xf]  ;;  %v2754_v48 = vld [vmem:[#allocation5 + $0x6c] sm:$0xf0]  ;;  %v2327_v50 = vor.u32 %v2854_v43, %v2326_v42  ;;  %1279 = vmatpush.bf16.msra.mxu1 %v2071_v45  ;;  %v1995_v43 = vor.u32 %v2768_v33, %v1992_v34  ;;  %v1928_v33 = vld [vmem:[#allocation5 + $0x70] sm:$0xf0] }
  0x26   :  { %v2054_v49 = vld [vmem:[#allocation5 + $0x160] sm:$0xf]  ;;  %v2786_v51 = vld [vmem:[#allocation5 + $0x16c] sm:$0xf0]  ;;  %v1927_v56 = vor.u32 %v2754_v48, %v1926_v47  ;;  %1293 = vmatpush.bf16.msra.mxu2 %v2199_v46  ;;  %v2123_v47 = vor.u32 %v2800_v37, %v2120_v38  ;;  %v2764_v48 = vld [vmem:[#allocation5 + $0xc4] sm:$0xf] }
  0x27   :  { %v2182_v52 = vld [vmem:[#allocation5 + $0x260] sm:$0xf]  ;;  %v2818_v53 = vld [vmem:[#allocation5 + $0x26c] sm:$0xf0]  ;;  %v2055_v57 = vor.u32 %v2786_v51, %v2054_v49  ;;  %1307 = vmatpush.bf16.msra.mxu3 %v2327_v50  ;;  %v1976_v49 = vld [vmem:[#allocation5 + $0xd0] sm:$0xf0] }
  0x28   :  { %v2310_v54 = vld [vmem:[#allocation5 + $0x360] sm:$0xf]  ;;  %v2850_v55 = vld [vmem:[#allocation5 + $0x36c] sm:$0xf0]  ;;  %v2183_v58 = vor.u32 %v2818_v53, %v2182_v52  ;;  %1266 = vmatpush.bf16.msra.mxu0 %v1927_v56  ;;  %v2796_v50 = vld [vmem:[#allocation5 + $0x1c4] sm:$0xf] }
  0x29   :  { %v1910_v59 = vld [vmem:[#allocation5 + $0x40] sm:$0xf]  ;;  %v2750_v60 = vld [vmem:[#allocation5 + $0x4c] sm:$0xf0]  ;;  %v2311_v62 = vor.u32 %v2850_v55, %v2310_v54  ;;  %1280 = vmatpush.bf16.msra.mxu1 %v2055_v57  ;;  %v2104_v51 = vld [vmem:[#allocation5 + $0x1d0] sm:$0xf0] }
  0x2a   :  { %v2038_v61 = vld [vmem:[#allocation5 + $0x140] sm:$0xf]  ;;  %v2782_v63 = vld [vmem:[#allocation5 + $0x14c] sm:$0xf0]  ;;  %v1911_v4 = vor.u32 %v2750_v60, %v1910_v59  ;;  %1294 = vmatpush.bf16.msra.mxu2 %v2183_v58  ;;  %v1979_v59 = vor.u32 %v2764_v48, %v1976_v49  ;;  %v2784_v34 = vld [vmem:[#allocation5 + $0x164] sm:$0xf] }
  0x2b   :  { %v2166_v0 = vld [vmem:[#allocation5 + $0x240] sm:$0xf]  ;;  %v2814_v1 = vld [vmem:[#allocation5 + $0x24c] sm:$0xf0]  ;;  %v2039_v5 = vor.u32 %v2782_v63, %v2038_v61  ;;  %1308 = vmatpush.bf16.msra.mxu3 %v2311_v62  ;;  %v2760_v62 = vld [vmem:[#allocation5 + $0xa4] sm:$0xf]  ;;  %v2107_v63 = vor.u32 %v2796_v50, %v2104_v51 }
  0x2c   :  { %v2294_v2 = vld [vmem:[#allocation5 + $0x340] sm:$0xf]  ;;  %v2846_v3 = vld [vmem:[#allocation5 + $0x34c] sm:$0xf0]  ;;  %v2167_v6 = vor.u32 %v2814_v1, %v2166_v0  ;;  %1267 = vmatpush.bf16.msra.mxu0 %v1911_v4  ;;  %v1960_v0 = vld [vmem:[#allocation5 + $0xb0] sm:$0xf0] }
  0x2d   :  { %v1894_v7 = vld [vmem:[#allocation5 + $0x20] sm:$0xf]  ;;  %v2746_v8 = vld [vmem:[#allocation5 + $0x2c] sm:$0xf0]  ;;  %v2295_v10 = vor.u32 %v2846_v3, %v2294_v2  ;;  %1281 = vmatpush.bf16.msra.mxu1 %v2039_v5  ;;  %v83_v1 = vld [vmem:[#allocation2 + $0x8] sm:$0xff] }
  0x2e   :  { %v2022_v9 = vld [vmem:[#allocation5 + $0x120] sm:$0xf]  ;;  %v2778_v11 = vld [vmem:[#allocation5 + $0x12c] sm:$0xf0]  ;;  %v1895_v16 = vor.u32 %v2746_v8, %v1894_v7  ;;  %1295 = vmatpush.bf16.msra.mxu2 %v2167_v6  ;;  %v89_v2 = vld [vmem:[#allocation2 + $0x38] sm:$0xff] }
  0x2f   :  { %v2150_v12 = vld [vmem:[#allocation5 + $0x220] sm:$0xf]  ;;  %v2810_v13 = vld [vmem:[#allocation5 + $0x22c] sm:$0xf0]  ;;  %v2023_v19 = vor.u32 %v2778_v11, %v2022_v9  ;;  %1309 = vmatpush.bf16.msra.mxu3 %v2295_v10  ;;  %v2792_v3 = vld [vmem:[#allocation5 + $0x1a4] sm:$0xf]  ;;  %v3156_v6 = vpack.c.bf16 %v89_v2, %v83_v1 }
  0x30   :  { %v2278_v14 = vld [vmem:[#allocation5 + $0x320] sm:$0xf]  ;;  %v2842_v15 = vld [vmem:[#allocation5 + $0x32c] sm:$0xf0]  ;;  %v2151_v20 = vor.u32 %v2810_v13, %v2150_v12  ;;  %1268 = vmatpush.bf16.msra.mxu0 %v1895_v16  ;;  %v2088_v4 = vld [vmem:[#allocation5 + $0x1b0] sm:$0xf0]  ;;  %v1963_v12 = vor.u32 %v2760_v62, %v1960_v0 }
  0x31   :  { %v1878_v17 = vld [vmem:[#allocation5] sm:$0xf]  ;;  %v2742_v18 = vld [vmem:[#allocation5 + $0xc] sm:$0xf0]  ;;  %v2279_v24 = vor.u32 %v2842_v15, %v2278_v14  ;;  %1282 = vmatpush.bf16.msra.mxu1 %v2023_v19  ;;  %v2756_v13 = vld [vmem:[#allocation5 + $0x84] sm:$0xf]  ;;  %v2091_v16 = vor.u32 %v2792_v3, %v2088_v4 }
  0x32   :  { %v2006_v21 = vld [vmem:[#allocation5 + $0x100] sm:$0xf]  ;;  %v2774_v22 = vld [vmem:[#allocation5 + $0x10c] sm:$0xf0]  ;;  %v1879_v31 = vor.u32 %v2742_v18, %v1878_v17  ;;  %1296 = vmatpush.bf16.msra.mxu2 %v2151_v20  ;;  %v1944_v14 = vld [vmem:[#allocation5 + $0x90] sm:$0xf0] }
  0x33   :  { %v2134_v23 = vld [vmem:[#allocation5 + $0x200] sm:$0xf]  ;;  %v2806_v25 = vld [vmem:[#allocation5 + $0x20c] sm:$0xf0]  ;;  %v2007_v35 = vor.u32 %v2774_v22, %v2006_v21  ;;  %1310 = vmatpush.bf16.msra.mxu3 %v2279_v24  ;;  %v85_v18 = vld [vmem:[#allocation2 + $0x18] sm:$0xff] }
  0x34   :  { %v2262_v26 = vld [vmem:[#allocation5 + $0x300] sm:$0xf]  ;;  %v2838_v27 = vld [vmem:[#allocation5 + $0x30c] sm:$0xf0]  ;;  %v2135_v36 = vor.u32 %v2806_v25, %v2134_v23  ;;  %1269 = vmatpush.bf16.msra.mxu0 %v1879_v31  ;;  %v91_v19 = vld [vmem:[#allocation2 + $0x48] sm:$0xff] }
  0x35   :  { %v2502_v28 = vld [vmem:[#allocation5 + $0x4e0] sm:$0xf]  ;;  %v2898_v29 = vld [vmem:[#allocation5 + $0x4ec] sm:$0xf0]  ;;  %v2263_v39 = vor.u32 %v2838_v27, %v2262_v26  ;;  %1283 = vmatpush.bf16.msra.mxu1 %v2007_v35  ;;  %v2788_v20 = vld [vmem:[#allocation5 + $0x184] sm:$0xf]  ;;  %v3161_v23 = vpack.c.bf16 %v91_v19, %v85_v18  ;;  %v1947_v26 = vor.u32 %v2756_v13, %v1944_v14 }
  0x36   :  { %v2630_v30 = vld [vmem:[#allocation5 + $0x5e0] sm:$0xf]  ;;  %v2930_v32 = vld [vmem:[#allocation5 + $0x5ec] sm:$0xf0]  ;;  %v2503_v40 = vor.u32 %v2898_v29, %v2502_v28  ;;  %1297 = vmatpush.bf16.msra.mxu2 %v2135_v36  ;;  %v2072_v21 = vld [vmem:[#allocation5 + $0x190] sm:$0xf0] }
  0x37   :  { %v2486_v41 = vld [vmem:[#allocation5 + $0x4c0] sm:$0xf]  ;;  %v2631_v42 = vor.u32 %v2930_v32, %v2630_v30  ;;  %v2894_v44 = vld [vmem:[#allocation5 + $0x4cc] sm:$0xf0]  ;;  %1311 = vmatpush.bf16.msra.mxu3 %v2263_v39  ;;  %v2075_v30 = vor.u32 %v2788_v20, %v2072_v21  ;;  %v2752_v32 = vld [vmem:[#allocation5 + $0x64] sm:$0xf] }
  0x38   :  { %v2614_v45 = vld [vmem:[#allocation5 + $0x5c0] sm:$0xf]  ;;  %v2926_v46 = vld [vmem:[#allocation5 + $0x5cc] sm:$0xf0]  ;;  %1318 = vmatpush.bf16.msrb.mxu0 %v2503_v40  ;;  %v2487_v54 = vor.u32 %v2894_v44, %v2486_v41  ;;  %1284 = vmatmul.bf16.vlgmr.msra.gmra.mxu1 %v3156_v6  ;;  %v2056_v35 = vld [vmem:[#allocation5 + $0x170] sm:$0xf0]  ;;  %v1931_v38 = vor.u32 %v2752_v32, %v1928_v33 }
  0x39   :  { %v82_v52 = vld [vmem:[#allocation2] sm:$0xff]  ;;  %v88_v53 = vld [vmem:[#allocation2 + $0x30] sm:$0xff]  ;;  %1332 = vmatpush.bf16.msrb.mxu1 %v2631_v42  ;;  %v2615_v58 = vor.u32 %v2926_v46, %v2614_v45  ;;  %v2059_v42 = vor.u32 %v2784_v34, %v2056_v35 }
  0x3a   :  { %v2470_v55 = vld [vmem:[#allocation5 + $0x4a0] sm:$0xf]  ;;  %v2890_v56 = vld [vmem:[#allocation5 + $0x4ac] sm:$0xf0]  ;;  %v3153_v57 = vpack.c.bf16 %v88_v53, %v82_v52  ;;  %1346 = vmatpush.bf16.msrb.mxu2 %v1995_v43  ;;  %1312 = vmatmul.bf16.vlgmr.msra.gmra.mxu3 %v3161_v23  ;;  %v2748_v44 = vld [vmem:[#allocation5 + $0x44] sm:$0xf] }
  0x3b   :  { %v2598_v60 = vld [vmem:[#allocation5 + $0x5a0] sm:$0xf]  ;;  %v2922_v61 = vld [vmem:[#allocation5 + $0x5ac] sm:$0xf0]  ;;  %1360 = vmatpush.bf16.msrb.mxu3 %v2123_v47  ;;  %v2471_v7 = vor.u32 %v2890_v56, %v2470_v55  ;;  %v1912_v45 = vld [vmem:[#allocation5 + $0x50] sm:$0xf0] }
  0x3c   :  { %1270 = vmatmul.bf16.vlgmr.msra.gmra.mxu0 %v3153_v57  ;;  %v2454_v5 = vld [vmem:[#allocation5 + $0x480] sm:$0xf]  ;;  %v2886_v8 = vld [vmem:[#allocation5 + $0x48c] sm:$0xf0]  ;;  %v2599_v11 = vor.u32 %v2922_v61, %v2598_v60  ;;  %v2780_v46 = vld [vmem:[#allocation5 + $0x144] sm:$0xf]  ;;  %v1915_v50 = vor.u32 %v2748_v44, %v1912_v45 }
  0x3d   :  { %1319 = vmatpush.bf16.msrb.mxu0 %v2487_v54  ;;  %v2582_v9 = vld [vmem:[#allocation5 + $0x580] sm:$0xf]  ;;  %v2918_v10 = vld [vmem:[#allocation5 + $0x58c] sm:$0xf0]  ;;  %1333 = vmatpush.bf16.msrb.mxu1 %v2615_v58  ;;  %v2455_v24 = vor.u32 %v2886_v8, %v2454_v5  ;;  %v2040_v47 = vld [vmem:[#allocation5 + $0x150] sm:$0xf0] }
  0x3e   :  { %1347 = vmatpush.bf16.msrb.mxu2 %v1979_v59  ;;  %v84_v15 = vld [vmem:[#allocation2 + $0x10] sm:$0xff]  ;;  %v90_v17 = vld [vmem:[#allocation2 + $0x40] sm:$0xff]  ;;  %v2583_v25 = vor.u32 %v2918_v10, %v2582_v9  ;;  %v2043_v54 = vor.u32 %v2780_v46, %v2040_v47 }
  0x3f   :  { %1361 = vmatpush.bf16.msrb.mxu3 %v2107_v63  ;;  %v3159_v22 = vpack.c.bf16 %v90_v17, %v84_v15  ;;  %v2438_v27 = vld [vmem:[#allocation5 + $0x460] sm:$0xf]  ;;  %v2882_v28 = vld [vmem:[#allocation5 + $0x46c] sm:$0xf0]  ;;  %v2744_v56 = vld [vmem:[#allocation5 + $0x24] sm:$0xf] }
  0x40   :  { %v2566_v29 = vld [vmem:[#allocation5 + $0x560] sm:$0xf]  ;;  %v2914_v31 = vld [vmem:[#allocation5 + $0x56c] sm:$0xf0]  ;;  %v2439_v36 = vor.u32 %v2882_v28, %v2438_v27  ;;  %v1896_v58 = vld [vmem:[#allocation5 + $0x30] sm:$0xf0] }
  0x41   :  { %1320 = vmatpush.bf16.msrb.mxu0 %v2471_v7  ;;  %1334 = vmatpush.bf16.msrb.mxu1 %v2599_v11  ;;  %v2567_v37 = vor.u32 %v2914_v31, %v2566_v29  ;;  %v2422_v39 = vld [vmem:[#allocation5 + $0x440] sm:$0xf]  ;;  %v2878_v40 = vld [vmem:[#allocation5 + $0x44c] sm:$0xf0]  ;;  %v2776_v59 = vld [vmem:[#allocation5 + $0x124] sm:$0xf]  ;;  %v1899_v2 = vor.u32 %v2744_v56, %v1896_v58 }
  0x42   :  { %1348 = vmatpush.bf16.msrb.mxu2 %v1963_v12  ;;  %v2550_v41 = vld [vmem:[#allocation5 + $0x540] sm:$0xf]  ;;  %v2910_v43 = vld [vmem:[#allocation5 + $0x54c] sm:$0xf0]  ;;  %v2423_v48 = vor.u32 %v2878_v40, %v2422_v39  ;;  %v2024_v60 = vld [vmem:[#allocation5 + $0x130] sm:$0xf0] }
  0x43   :  { %1362 = vmatpush.bf16.msrb.mxu3 %v2091_v16  ;;  %1298 = vmatmul.bf16.vlgmr.msra.gmra.mxu2 %v3159_v22  ;;  %v2551_v49 = vor.u32 %v2910_v43, %v2550_v41  ;;  %v2406_v51 = vld [vmem:[#allocation5 + $0x420] sm:$0xf]  ;;  %v2874_v52 = vld [vmem:[#allocation5 + $0x42c] sm:$0xf0]  ;;  %v2740_v4 = vld [vmem:[#allocation5 + $0x4] sm:$0xf]  ;;  %v2027_v7 = vor.u32 %v2776_v59, %v2024_v60 }
  0x44   :  { %v2534_v53 = vld [vmem:[#allocation5 + $0x520] sm:$0xf]  ;;  %v2906_v55 = vld [vmem:[#allocation5 + $0x52c] sm:$0xf0]  ;;  %v2407_v61 = vor.u32 %v2874_v52, %v2406_v51  ;;  %v1880_v5 = vld [vmem:[#allocation5 + $0x10] sm:$0xf0] }
  0x45   :  { %1321 = vmatpush.bf16.msrb.mxu0 %v2455_v24  ;;  %1335 = vmatpush.bf16.msrb.mxu1 %v2583_v25  ;;  %v2390_v62 = vld [vmem:[#allocation5 + $0x400] sm:$0xf]  ;;  %v2870_v63 = vld [vmem:[#allocation5 + $0x40c] sm:$0xf0]  ;;  %v2535_v1 = vor.u32 %v2906_v55, %v2534_v53  ;;  %v2772_v8 = vld [vmem:[#allocation5 + $0x104] sm:$0xf]  ;;  %v1883_v19 = vor.u32 %v2740_v4, %v1880_v5 }
  0x46   :  { %1349 = vmatpush.bf16.msrb.mxu2 %v1947_v26  ;;  %v2518_v0 = vld [vmem:[#allocation5 + $0x500] sm:$0xf]  ;;  %v2902_v3 = vld [vmem:[#allocation5 + $0x50c] sm:$0xf0]  ;;  %v2008_v9 = vld [vmem:[#allocation5 + $0x110] sm:$0xf0]  ;;  %v2391_v14 = vor.u32 %v2870_v63, %v2390_v62 }
  0x47   :  { %1363 = vmatpush.bf16.msrb.mxu3 %v2075_v30  ;;  %v2832_v10 = vld [vmem:[#allocation5 + $0x2e4] sm:$0xf]  ;;  %v2248_v11 = vld [vmem:[#allocation5 + $0x2f0] sm:$0xf0]  ;;  %v2519_v18 = vor.u32 %v2902_v3, %v2518_v0  ;;  %v2011_v25 = vor.u32 %v2772_v8, %v2008_v9  ;;  %v87_v27 = vld [vmem:[#allocation2 + $0x28] sm:$0xff] }
  0x48   :  { %v2864_v12 = vld [vmem:[#allocation5 + $0x3e4] sm:$0xf]  ;;  %v2376_v13 = vld [vmem:[#allocation5 + $0x3f0] sm:$0xf0]  ;;  %v2251_v26 = vor.u32 %v2832_v10, %v2248_v11  ;;  %v93_v28 = vld [vmem:[#allocation2 + $0x58] sm:$0xff] }
  0x49   :  { %1322 = vmatpush.bf16.msrb.mxu0 %v2439_v36  ;;  %1336 = vmatpush.bf16.msrb.mxu1 %v2567_v37  ;;  %v2896_v15 = vld [vmem:[#allocation5 + $0x4e4] sm:$0xf]  ;;  %v2504_v16 = vld [vmem:[#allocation5 + $0x4f0] sm:$0xf0]  ;;  %v2379_v29 = vor.u32 %v2864_v12, %v2376_v13  ;;  %v3167_v39 = vpack.c.bf16 %v93_v28, %v87_v27 }
  0x4a   :  { %1350 = vmatpush.bf16.msrb.mxu2 %v1931_v38  ;;  %v2928_v17 = vld [vmem:[#allocation5 + $0x5e4] sm:$0xf]  ;;  %v2632_v20 = vld [vmem:[#allocation5 + $0x5f0] sm:$0xf0]  ;;  %v2507_v30 = vor.u32 %v2896_v15, %v2504_v16 }
  0x4b   :  { %1364 = vmatpush.bf16.msrb.mxu3 %v2059_v42  ;;  %v86_v21 = vld [vmem:[#allocation2 + $0x20] sm:$0xff]  ;;  %v92_v24 = vld [vmem:[#allocation2 + $0x50] sm:$0xff]  ;;  %v2635_v34 = vor.u32 %v2928_v17, %v2632_v20 }
  0x4c   :  { %v2828_v31 = vld [vmem:[#allocation5 + $0x2c4] sm:$0xf]  ;;  %v2232_v32 = vld [vmem:[#allocation5 + $0x2d0] sm:$0xf0]  ;;  %v3165_v35 = vpack.c.bf16 %v92_v24, %v86_v21 }
  0x4d   :  { %1323 = vmatpush.bf16.msrb.mxu0 %v2423_v48  ;;  %1337 = vmatpush.bf16.msrb.mxu1 %v2551_v49  ;;  %v2860_v33 = vld [vmem:[#allocation5 + $0x3c4] sm:$0xf]  ;;  %v2360_v36 = vld [vmem:[#allocation5 + $0x3d0] sm:$0xf0]  ;;  %v2235_v42 = vor.u32 %v2828_v31, %v2232_v32 }
  0x4e   :  { %1351 = vmatpush.bf16.msrb.mxu2 %v1915_v50  ;;  %v2892_v37 = vld [vmem:[#allocation5 + $0x4c4] sm:$0xf]  ;;  %v2488_v38 = vld [vmem:[#allocation5 + $0x4d0] sm:$0xf0]  ;;  %v2363_v43 = vor.u32 %v2860_v33, %v2360_v36 }
  0x4f   :  { %1365 = vmatpush.bf16.msrb.mxu3 %v2043_v54  ;;  %v2924_v40 = vld [vmem:[#allocation5 + $0x5c4] sm:$0xf]  ;;  %v2616_v41 = vld [vmem:[#allocation5 + $0x5d0] sm:$0xf0]  ;;  %v2491_v44 = vor.u32 %v2892_v37, %v2488_v38 }
  0x50   :  { %v2824_v45 = vld [vmem:[#allocation5 + $0x2a4] sm:$0xf]  ;;  %v2216_v46 = vld [vmem:[#allocation5 + $0x2b0] sm:$0xf0]  ;;  %v2619_v48 = vor.u32 %v2924_v40, %v2616_v41 }
  0x51   :  { %1324 = vmatpush.bf16.msrb.mxu0 %v2407_v61  ;;  %1338 = vmatpush.bf16.msrb.mxu1 %v2535_v1  ;;  %v2856_v47 = vld [vmem:[#allocation5 + $0x3a4] sm:$0xf]  ;;  %v2344_v49 = vld [vmem:[#allocation5 + $0x3b0] sm:$0xf0]  ;;  %v2219_v54 = vor.u32 %v2824_v45, %v2216_v46 }
  0x52   :  { %1352 = vmatpush.bf16.msrb.mxu2 %v1899_v2  ;;  %v2888_v50 = vld [vmem:[#allocation5 + $0x4a4] sm:$0xf]  ;;  %v2472_v51 = vld [vmem:[#allocation5 + $0x4b0] sm:$0xf0]  ;;  %v2347_v55 = vor.u32 %v2856_v47, %v2344_v49 }
  0x53   :  { %1366 = vmatpush.bf16.msrb.mxu3 %v2027_v7  ;;  %v2920_v52 = vld [vmem:[#allocation5 + $0x5a4] sm:$0xf]  ;;  %v2600_v53 = vld [vmem:[#allocation5 + $0x5b0] sm:$0xf0]  ;;  %v2475_v56 = vor.u32 %v2888_v50, %v2472_v51 }
  0x54   :  { %v2820_v58 = vld [vmem:[#allocation5 + $0x284] sm:$0xf]  ;;  %v2200_v59 = vld [vmem:[#allocation5 + $0x290] sm:$0xf0]  ;;  %v2603_v61 = vor.u32 %v2920_v52, %v2600_v53 }
  0x55   :  { %1325 = vmatpush.bf16.msrb.mxu0 %v2391_v14  ;;  %1339 = vmatpush.bf16.msrb.mxu1 %v2519_v18  ;;  %v2852_v60 = vld [vmem:[#allocation5 + $0x384] sm:$0xf]  ;;  %v2328_v62 = vld [vmem:[#allocation5 + $0x390] sm:$0xf0]  ;;  %v2203_v3 = vor.u32 %v2820_v58, %v2200_v59  ;;  %v2771_v58 = vld [vmem:[#allocation5 + $0xf4] sm:$0xf0] }
  0x56   :  { %1353 = vmatpush.bf16.msrb.mxu2 %v1883_v19  ;;  %v2884_v63 = vld [vmem:[#allocation5 + $0x484] sm:$0xf]  ;;  %v2456_v0 = vld [vmem:[#allocation5 + $0x490] sm:$0xf0]  ;;  %v2331_v4 = vor.u32 %v2852_v60, %v2328_v62  ;;  %v2126_v59 = vld [vmem:[#allocation5 + $0x1e8] sm:$0xf] }
  0x57   :  { %1367 = vmatpush.bf16.msrb.mxu3 %v2011_v25  ;;  %v2916_v1 = vld [vmem:[#allocation5 + $0x584] sm:$0xf]  ;;  %v2584_v2 = vld [vmem:[#allocation5 + $0x590] sm:$0xf0]  ;;  %v2459_v5 = vor.u32 %v2884_v63, %v2456_v0  ;;  %v2254_v62 = vld [vmem:[#allocation5 + $0x2e8] sm:$0xf] }
  0x58   :  { %1326 = vmatmul.bf16.vlgmr.msrb.gmra.mxu0 %v3165_v35  ;;  %1340 = vmatmul.bf16.vlgmr.msrb.gmra.mxu1 %v3167_v39  ;;  %v2816_v7 = vld [vmem:[#allocation5 + $0x264] sm:$0xf]  ;;  %v2184_v8 = vld [vmem:[#allocation5 + $0x270] sm:$0xf0]  ;;  %v2587_v10 = vor.u32 %v2916_v1, %v2584_v2  ;;  %v2835_v63 = vld [vmem:[#allocation5 + $0x2f4] sm:$0xf0] }
  0x59   :  { %1374 = vmatpush.bf16.msra.mxu0 %v2251_v26  ;;  %1388 = vmatpush.bf16.msra.mxu1 %v2379_v29  ;;  %v2848_v9 = vld [vmem:[#allocation5 + $0x364] sm:$0xf]  ;;  %v2312_v11 = vld [vmem:[#allocation5 + $0x370] sm:$0xf0]  ;;  %v2187_v16 = vor.u32 %v2816_v7, %v2184_v8  ;;  %v2382_v2 = vld [vmem:[#allocation5 + $0x3e8] sm:$0xf]  ;;  %v2255_v8 = vor.u32 %v2835_v63, %v2254_v62 }
  0x5a   :  { %1402 = vmatpush.bf16.msra.mxu2 %v2507_v30  ;;  %1368 = vmatmul.bf16.vlgmr.msrb.gmra.mxu3 %v3156_v6  ;;  %v2880_v12 = vld [vmem:[#allocation5 + $0x464] sm:$0xf]  ;;  %v2440_v13 = vld [vmem:[#allocation5 + $0x470] sm:$0xf0]  ;;  %v2315_v17 = vor.u32 %v2848_v9, %v2312_v11  ;;  %v1982_v9 = vld [vmem:[#allocation5 + $0xc8] sm:$0xf] }
  0x5b   :  { %1416 = vmatpush.bf16.msra.mxu3 %v2635_v34  ;;  %1354 = vmatmul.bf16.vlgmr.msrb.gmra.mxu2 %v3153_v57  ;;  %v2912_v14 = vld [vmem:[#allocation5 + $0x564] sm:$0xf]  ;;  %v2568_v15 = vld [vmem:[#allocation5 + $0x570] sm:$0xf0]  ;;  %v2443_v18 = vor.u32 %v2880_v12, %v2440_v13  ;;  %v2110_v11 = vld [vmem:[#allocation5 + $0x1c8] sm:$0xf] }
  0x5c   :  { %v2812_v19 = vld [vmem:[#allocation5 + $0x244] sm:$0xf]  ;;  %v2168_v20 = vld [vmem:[#allocation5 + $0x250] sm:$0xf0]  ;;  %v2571_v24 = vor.u32 %v2912_v14, %v2568_v15  ;;  %v2799_v13 = vld [vmem:[#allocation5 + $0x1d4] sm:$0xf0] }
  0x5d   :  { %1375 = vmatpush.bf16.msra.mxu0 %v2235_v42  ;;  %1389 = vmatpush.bf16.msra.mxu1 %v2363_v43  ;;  %v2844_v21 = vld [vmem:[#allocation5 + $0x344] sm:$0xf]  ;;  %v2296_v25 = vld [vmem:[#allocation5 + $0x350] sm:$0xf0]  ;;  %v2171_v30 = vor.u32 %v2812_v19, %v2168_v20  ;;  %v2238_v14 = vld [vmem:[#allocation5 + $0x2c8] sm:$0xf]  ;;  %v2111_v19 = vor.u32 %v2799_v13, %v2110_v11 }
  0x5e   :  { %1403 = vmatpush.bf16.msra.mxu2 %v2491_v44  ;;  %v2876_v26 = vld [vmem:[#allocation5 + $0x444] sm:$0xf]  ;;  %v2424_v27 = vld [vmem:[#allocation5 + $0x450] sm:$0xf0]  ;;  %v2299_v31 = vor.u32 %v2844_v21, %v2296_v25  ;;  %v2831_v15 = vld [vmem:[#allocation5 + $0x2d4] sm:$0xf0] }
  0x5f   :  { %1417 = vmatpush.bf16.msra.mxu3 %v2619_v48  ;;  %v2908_v28 = vld [vmem:[#allocation5 + $0x544] sm:$0xf]  ;;  %v2552_v29 = vld [vmem:[#allocation5 + $0x550] sm:$0xf0]  ;;  %v2427_v32 = vor.u32 %v2876_v26, %v2424_v27  ;;  %v2239_v20 = vor.u32 %v2831_v15, %v2238_v14  ;;  %v1966_v21 = vld [vmem:[#allocation5 + $0xa8] sm:$0xf] }
  0x60   :  { %v2808_v33 = vld [vmem:[#allocation5 + $0x224] sm:$0xf]  ;;  %v2152_v34 = vld [vmem:[#allocation5 + $0x230] sm:$0xf0]  ;;  %v2555_v37 = vor.u32 %v2908_v28, %v2552_v29  ;;  %v2094_v25 = vld [vmem:[#allocation5 + $0x1a8] sm:$0xf] }
  0x61   :  { %1376 = vmatpush.bf16.msra.mxu0 %v2219_v54  ;;  %1390 = vmatpush.bf16.msra.mxu1 %v2347_v55  ;;  %v2840_v36 = vld [vmem:[#allocation5 + $0x324] sm:$0xf]  ;;  %v2280_v38 = vld [vmem:[#allocation5 + $0x330] sm:$0xf0]  ;;  %v2155_v44 = vor.u32 %v2808_v33, %v2152_v34  ;;  %v2795_v27 = vld [vmem:[#allocation5 + $0x1b4] sm:$0xf0] }
  0x62   :  { %1404 = vmatpush.bf16.msra.mxu2 %v2475_v56  ;;  %v2872_v40 = vld [vmem:[#allocation5 + $0x424] sm:$0xf]  ;;  %v2408_v41 = vld [vmem:[#allocation5 + $0x430] sm:$0xf0]  ;;  %v2283_v48 = vor.u32 %v2840_v36, %v2280_v38  ;;  %v1998_v56 = vld [vmem:[#allocation5 + $0xe8] sm:$0xf]  ;;  %v2095_v33 = vor.u32 %v2795_v27, %v2094_v25 }
  0x63   :  { %1418 = vmatpush.bf16.msra.mxu3 %v2603_v61  ;;  %v2904_v42 = vld [vmem:[#allocation5 + $0x524] sm:$0xf]  ;;  %v2536_v43 = vld [vmem:[#allocation5 + $0x530] sm:$0xf0]  ;;  %v2411_v49 = vor.u32 %v2872_v40, %v2408_v41  ;;  %v2803_v61 = vld [vmem:[#allocation5 + $0x1f4] sm:$0xf0] }
  0x64   :  { %v2804_v45 = vld [vmem:[#allocation5 + $0x204] sm:$0xf]  ;;  %v2136_v46 = vld [vmem:[#allocation5 + $0x210] sm:$0xf0]  ;;  %v2539_v53 = vor.u32 %v2904_v42, %v2536_v43  ;;  %v2127_v7 = vor.u32 %v2803_v61, %v2126_v59  ;;  %v2222_v28 = vld [vmem:[#allocation5 + $0x2a8] sm:$0xf] }
  0x65   :  { %1377 = vmatpush.bf16.msra.mxu0 %v2203_v3  ;;  %1391 = vmatpush.bf16.msra.mxu1 %v2331_v4  ;;  %v2836_v47 = vld [vmem:[#allocation5 + $0x304] sm:$0xf]  ;;  %v2264_v50 = vld [vmem:[#allocation5 + $0x310] sm:$0xf0]  ;;  %v2139_v60 = vor.u32 %v2804_v45, %v2136_v46  ;;  %v2867_v3 = vld [vmem:[#allocation5 + $0x3f4] sm:$0xf0] }
  0x66   :  { %1405 = vmatpush.bf16.msra.mxu2 %v2459_v5  ;;  %v2868_v51 = vld [vmem:[#allocation5 + $0x404] sm:$0xf]  ;;  %v2392_v52 = vld [vmem:[#allocation5 + $0x410] sm:$0xf0]  ;;  %v2267_v0 = vor.u32 %v2836_v47, %v2264_v50  ;;  %v1999_v5 = vor.u32 %v2771_v58, %v1998_v56  ;;  %v2383_v12 = vor.u32 %v2867_v3, %v2382_v2  ;;  %v2827_v29 = vld [vmem:[#allocation5 + $0x2b4] sm:$0xf0] }
  0x67   :  { %1419 = vmatpush.bf16.msra.mxu3 %v2587_v10  ;;  %v2900_v54 = vld [vmem:[#allocation5 + $0x504] sm:$0xf]  ;;  %v2520_v55 = vld [vmem:[#allocation5 + $0x510] sm:$0xf0]  ;;  %v2395_v1 = vor.u32 %v2868_v51, %v2392_v52  ;;  %v2767_v10 = vld [vmem:[#allocation5 + $0xd4] sm:$0xf0]  ;;  %v2223_v34 = vor.u32 %v2827_v29, %v2222_v28 }
  0x68   :  { %v2523_v4 = vor.u32 %v2900_v54, %v2520_v55  ;;  %v1950_v36 = vld [vmem:[#allocation5 + $0x88] sm:$0xf]  ;;  %v2791_v41 = vld [vmem:[#allocation5 + $0x194] sm:$0xf0] }
  0x69   :  { %1378 = vmatpush.bf16.msra.mxu0 %v2187_v16  ;;  %1392 = vmatpush.bf16.msra.mxu1 %v2315_v17  ;;  %v2366_v16 = vld [vmem:[#allocation5 + $0x3c8] sm:$0xf]  ;;  %v2863_v17 = vld [vmem:[#allocation5 + $0x3d4] sm:$0xf0] }
  0x6a   :  { %1406 = vmatpush.bf16.msra.mxu2 %v2443_v18  ;;  %v1983_v18 = vor.u32 %v2767_v10, %v1982_v9  ;;  %v2367_v26 = vor.u32 %v2863_v17, %v2366_v16  ;;  %v2078_v38 = vld [vmem:[#allocation5 + $0x188] sm:$0xf]  ;;  %v2823_v43 = vld [vmem:[#allocation5 + $0x294] sm:$0xf0] }
  0x6b   :  { %1420 = vmatpush.bf16.msra.mxu3 %v2571_v24  ;;  %v2763_v24 = vld [vmem:[#allocation5 + $0xb4] sm:$0xf0]  ;;  %v2206_v42 = vld [vmem:[#allocation5 + $0x288] sm:$0xf]  ;;  %v2079_v47 = vor.u32 %v2791_v41, %v2078_v38  ;;  %v2769_v41 = vld [vmem:[#allocation5 + $0xec] sm:$0xf] }
  0x6c   :  { %v2855_v45 = vld [vmem:[#allocation5 + $0x394] sm:$0xf0]  ;;  %v2062_v51 = vld [vmem:[#allocation5 + $0x168] sm:$0xf] }
  0x6d   :  { %1379 = vmatpush.bf16.msra.mxu0 %v2171_v30  ;;  %1393 = vmatpush.bf16.msra.mxu1 %v2299_v31  ;;  %v2350_v30 = vld [vmem:[#allocation5 + $0x3a8] sm:$0xf]  ;;  %v2859_v31 = vld [vmem:[#allocation5 + $0x3b4] sm:$0xf0] }
  0x6e   :  { %1407 = vmatpush.bf16.msra.mxu2 %v2427_v32  ;;  %v1967_v32 = vor.u32 %v2763_v24, %v1966_v21  ;;  %v2351_v40 = vor.u32 %v2859_v31, %v2350_v30  ;;  %v2755_v50 = vld [vmem:[#allocation5 + $0x74] sm:$0xf0]  ;;  %v2190_v54 = vld [vmem:[#allocation5 + $0x268] sm:$0xf] }
  0x6f   :  { %1421 = vmatpush.bf16.msra.mxu3 %v2555_v37  ;;  %v2759_v37 = vld [vmem:[#allocation5 + $0x94] sm:$0xf0]  ;;  %v2318_v56 = vld [vmem:[#allocation5 + $0x368] sm:$0xf] }
  0x70   :  { %v1951_v46 = vor.u32 %v2759_v37, %v1950_v36  ;;  %v2819_v55 = vld [vmem:[#allocation5 + $0x274] sm:$0xf0]  ;;  %v1918_v62 = vld [vmem:[#allocation5 + $0x48] sm:$0xf] }
  0x71   :  { %1380 = vmatpush.bf16.msra.mxu0 %v2155_v44  ;;  %1394 = vmatpush.bf16.msra.mxu1 %v2283_v48  ;;  %v2334_v44 = vld [vmem:[#allocation5 + $0x388] sm:$0xf]  ;;  %v2207_v48 = vor.u32 %v2823_v43, %v2206_v42  ;;  %v2851_v58 = vld [vmem:[#allocation5 + $0x374] sm:$0xf0]  ;;  %v2191_v61 = vor.u32 %v2819_v55, %v2190_v54  ;;  %v2000_v42 = vld [vmem:[#allocation5 + $0xf8] sm:$0xf0] }
  0x72   :  { %1408 = vmatpush.bf16.msra.mxu2 %v2411_v49  ;;  %v1934_v49 = vld [vmem:[#allocation5 + $0x68] sm:$0xf]  ;;  %v2335_v52 = vor.u32 %v2855_v45, %v2334_v44  ;;  %v2751_v63 = vld [vmem:[#allocation5 + $0x54] sm:$0xf0]  ;;  %v2801_v45 = vld [vmem:[#allocation5 + $0x1ec] sm:$0xf] }
  0x73   :  { %1422 = vmatpush.bf16.msra.mxu3 %v2539_v53  ;;  %v2787_v53 = vld [vmem:[#allocation5 + $0x174] sm:$0xf0]  ;;  %v1935_v59 = vor.u32 %v2755_v50, %v1934_v49  ;;  %v2174_v3 = vld [vmem:[#allocation5 + $0x248] sm:$0xf]  ;;  %v2003_v50 = vor.u32 %v2769_v41, %v2000_v42 }
  0x74   :  { %v2783_v2 = vld [vmem:[#allocation5 + $0x154] sm:$0xf0]  ;;  %v1902_v11 = vld [vmem:[#allocation5 + $0x28] sm:$0xf] }
  0x75   :  { %1381 = vmatpush.bf16.msra.mxu0 %v2139_v60  ;;  %1395 = vmatpush.bf16.msra.mxu1 %v2267_v0  ;;  %v2063_v60 = vor.u32 %v2787_v53, %v2062_v51  ;;  %v2046_v0 = vld [vmem:[#allocation5 + $0x148] sm:$0xf]  ;;  %v2779_v15 = vld [vmem:[#allocation5 + $0x134] sm:$0xf0] }
  0x76   :  { %1409 = vmatpush.bf16.msra.mxu2 %v2395_v1  ;;  %v2319_v1 = vor.u32 %v2851_v58, %v2318_v56  ;;  %v2047_v9 = vor.u32 %v2783_v2, %v2046_v0  ;;  %v2030_v13 = vld [vmem:[#allocation5 + $0x128] sm:$0xf]  ;;  %v2811_v17 = vld [vmem:[#allocation5 + $0x234] sm:$0xf0]  ;;  %v2765_v56 = vld [vmem:[#allocation5 + $0xcc] sm:$0xf] }
  0x77   :  { %1423 = vmatpush.bf16.msra.mxu3 %v2523_v4  ;;  %v2815_v4 = vld [vmem:[#allocation5 + $0x254] sm:$0xf0]  ;;  %v2158_v16 = vld [vmem:[#allocation5 + $0x228] sm:$0xf]  ;;  %v2031_v25 = vor.u32 %v2779_v15, %v2030_v13  ;;  %v1984_v58 = vld [vmem:[#allocation5 + $0xd8] sm:$0xf0] }
  0x78   :  { %1382 = vmatmul.bf16.vlgmr.msra.gmra.mxu0 %v3159_v22  ;;  %1396 = vmatmul.bf16.vlgmr.msra.gmra.mxu1 %v3161_v23  ;;  %v2175_v10 = vor.u32 %v2815_v4, %v2174_v3  ;;  %v1886_v21 = vld [vmem:[#allocation5 + $0x8] sm:$0xf]  ;;  %v2743_v24 = vld [vmem:[#allocation5 + $0x14] sm:$0xf0] }
  0x79   :  { %1430 = vmatpush.bf16.msrb.mxu0 %v1999_v5  ;;  %1444 = vmatpush.bf16.msrb.mxu1 %v2127_v7  ;;  %v2302_v5 = vld [vmem:[#allocation5 + $0x348] sm:$0xf]  ;;  %v2847_v7 = vld [vmem:[#allocation5 + $0x354] sm:$0xf0]  ;;  %v1887_v38 = vor.u32 %v2743_v24, %v1886_v21  ;;  %v2080_v21 = vld [vmem:[#allocation5 + $0x198] sm:$0xf0] }
  0x7a   :  { %1458 = vmatpush.bf16.msrb.mxu2 %v2255_v8  ;;  %1424 = vmatmul.bf16.vlgmr.msra.gmra.mxu3 %v3167_v39  ;;  %v1919_v8 = vor.u32 %v2751_v63, %v1918_v62  ;;  %v2303_v14 = vor.u32 %v2847_v7, %v2302_v5  ;;  %v2014_v27 = vld [vmem:[#allocation5 + $0x108] sm:$0xf]  ;;  %v2775_v28 = vld [vmem:[#allocation5 + $0x114] sm:$0xf0]  ;;  %v1987_v63 = vor.u32 %v2765_v56, %v1984_v58  ;;  %v2761_v5 = vld [vmem:[#allocation5 + $0xac] sm:$0xf] }
  0x7b   :  { %1472 = vmatpush.bf16.msrb.mxu3 %v2383_v12  ;;  %1410 = vmatmul.bf16.vlgmr.msra.gmra.mxu2 %v3165_v35  ;;  %v2747_v12 = vld [vmem:[#allocation5 + $0x34] sm:$0xf0]  ;;  %v2142_v29 = vld [vmem:[#allocation5 + $0x208] sm:$0xf]  ;;  %v2015_v43 = vor.u32 %v2775_v28, %v2014_v27  ;;  %v1968_v7 = vld [vmem:[#allocation5 + $0xb8] sm:$0xf0] }
  0x7c   :  { %v2807_v31 = vld [vmem:[#allocation5 + $0x214] sm:$0xf0]  ;;  %v2638_v37 = vld [vmem:[#allocation5 + $0x5e8] sm:$0xf] }
  0x7d   :  { %1431 = vmatpush.bf16.msrb.mxu0 %v1983_v18  ;;  %1445 = vmatpush.bf16.msrb.mxu1 %v2111_v19  ;;  %v2286_v18 = vld [vmem:[#allocation5 + $0x328] sm:$0xf]  ;;  %v2843_v19 = vld [vmem:[#allocation5 + $0x334] sm:$0xf0]  ;;  %v2143_v44 = vor.u32 %v2807_v31, %v2142_v29 }
  0x7e   :  { %1459 = vmatpush.bf16.msrb.mxu2 %v2239_v20  ;;  %v1903_v20 = vor.u32 %v2747_v12, %v1902_v11  ;;  %v2287_v30 = vor.u32 %v2843_v19, %v2286_v18  ;;  %v2899_v36 = vld [vmem:[#allocation5 + $0x4f4] sm:$0xf0]  ;;  %v2494_v51 = vld [vmem:[#allocation5 + $0x4c8] sm:$0xf]  ;;  %v1971_v12 = vor.u32 %v2761_v5, %v1968_v7  ;;  %v2757_v18 = vld [vmem:[#allocation5 + $0x8c] sm:$0xf] }
  0x7f   :  { %1473 = vmatpush.bf16.msrb.mxu3 %v2367_v26  ;;  %v2159_v26 = vor.u32 %v2811_v17, %v2158_v16  ;;  %v2622_v53 = vld [vmem:[#allocation5 + $0x5c8] sm:$0xf]  ;;  %v2927_v55 = vld [vmem:[#allocation5 + $0x5d4] sm:$0xf0]  ;;  %v1952_v19 = vld [vmem:[#allocation5 + $0x98] sm:$0xf0] }
  0x80   :  { %v2623_v62 = vor.u32 %v2927_v55, %v2622_v53  ;;  %v2478_v0 = vld [vmem:[#allocation5 + $0x4a8] sm:$0xf]  ;;  %v2923_v4 = vld [vmem:[#allocation5 + $0x5b4] sm:$0xf0]  ;;  %v2741_v7 = vld [vmem:[#allocation5 + $0xc] sm:$0xf] }
  0x81   :  { %1432 = vmatpush.bf16.msrb.mxu0 %v1967_v32  ;;  %1446 = vmatpush.bf16.msrb.mxu1 %v2095_v33  ;;  %v2270_v32 = vld [vmem:[#allocation5 + $0x308] sm:$0xf]  ;;  %v2839_v33 = vld [vmem:[#allocation5 + $0x314] sm:$0xf0] }
  0x82   :  { %1460 = vmatpush.bf16.msrb.mxu2 %v2223_v34  ;;  %v2510_v34 = vld [vmem:[#allocation5 + $0x4e8] sm:$0xf]  ;;  %v2919_v17 = vld [vmem:[#allocation5 + $0x594] sm:$0xf0] }
  0x83   :  { %1474 = vmatpush.bf16.msrb.mxu3 %v2351_v40  ;;  %v2931_v40 = vld [vmem:[#allocation5 + $0x5f4] sm:$0xf0]  ;;  %v2606_v2 = vld [vmem:[#allocation5 + $0x5a8] sm:$0xf] }
  0x84   :  { %v2639_v49 = vor.u32 %v2931_v40, %v2638_v37  ;;  %v2607_v11 = vor.u32 %v2923_v4, %v2606_v2  ;;  %v2462_v13 = vld [vmem:[#allocation5 + $0x488] sm:$0xf]  ;;  %v2883_v28 = vld [vmem:[#allocation5 + $0x474] sm:$0xf0] }
  0x85   :  { %1433 = vmatpush.bf16.msrb.mxu0 %v1951_v46  ;;  %1447 = vmatpush.bf16.msrb.mxu1 %v2079_v47  ;;  %v2128_v46 = vld [vmem:[#allocation5 + $0x1f8] sm:$0xf0]  ;;  %v2271_v47 = vor.u32 %v2839_v33, %v2270_v32  ;;  %v2590_v15 = vld [vmem:[#allocation5 + $0x588] sm:$0xf]  ;;  %v2915_v31 = vld [vmem:[#allocation5 + $0x574] sm:$0xf0] }
  0x86   :  { %1461 = vmatpush.bf16.msrb.mxu2 %v2207_v48  ;;  %v2511_v48 = vor.u32 %v2899_v36, %v2510_v34  ;;  %v2131_v54 = vor.u32 %v2801_v45, %v2128_v46  ;;  %v2446_v27 = vld [vmem:[#allocation5 + $0x468] sm:$0xf]  ;;  %v2753_v32 = vld [vmem:[#allocation5 + $0x6c] sm:$0xf]  ;;  %v1936_v33 = vld [vmem:[#allocation5 + $0x78] sm:$0xf0] }
  0x87   :  { %1475 = vmatpush.bf16.msrb.mxu3 %v2335_v52  ;;  %v2895_v52 = vld [vmem:[#allocation5 + $0x4d4] sm:$0xf0]  ;;  %v2574_v29 = vld [vmem:[#allocation5 + $0x568] sm:$0xf]  ;;  %v2785_v34 = vld [vmem:[#allocation5 + $0x16c] sm:$0xf]  ;;  %v2447_v37 = vor.u32 %v2883_v28, %v2446_v27  ;;  %v1939_v40 = vor.u32 %v2753_v32, %v1936_v33 }
  0x88   :  { %v2064_v36 = vld [vmem:[#allocation5 + $0x178] sm:$0xf0]  ;;  %v2430_v41 = vld [vmem:[#allocation5 + $0x448] sm:$0xf]  ;;  %v2879_v42 = vld [vmem:[#allocation5 + $0x454] sm:$0xf0] }
  0x89   :  { %1434 = vmatpush.bf16.msrb.mxu0 %v1935_v59  ;;  %1448 = vmatpush.bf16.msrb.mxu1 %v2063_v60  ;;  %v2797_v59 = vld [vmem:[#allocation5 + $0x1cc] sm:$0xf]  ;;  %v2112_v60 = vld [vmem:[#allocation5 + $0x1d8] sm:$0xf0]  ;;  %v2911_v45 = vld [vmem:[#allocation5 + $0x554] sm:$0xf0] }
  0x8a   :  { %1462 = vmatpush.bf16.msrb.mxu2 %v2191_v61  ;;  %v2495_v61 = vor.u32 %v2895_v52, %v2494_v51  ;;  %v2115_v3 = vor.u32 %v2797_v59, %v2112_v60  ;;  %v2749_v46 = vld [vmem:[#allocation5 + $0x4c] sm:$0xf]  ;;  %v2414_v53 = vld [vmem:[#allocation5 + $0x428] sm:$0xf]  ;;  %v2907_v58 = vld [vmem:[#allocation5 + $0x534] sm:$0xf0] }
  0x8b   :  { %1476 = vmatpush.bf16.msrb.mxu3 %v2319_v1  ;;  %v2891_v1 = vld [vmem:[#allocation5 + $0x4b4] sm:$0xf0]  ;;  %v2542_v55 = vld [vmem:[#allocation5 + $0x528] sm:$0xf]  ;;  %v2745_v59 = vld [vmem:[#allocation5 + $0x2c] sm:$0xf] }
  0x8c   :  { %v1904_v60 = vld [vmem:[#allocation5 + $0x38] sm:$0xf0]  ;;  %v2543_v2 = vor.u32 %v2907_v58, %v2542_v55  ;;  %v2526_v4 = vld [vmem:[#allocation5 + $0x508] sm:$0xf]  ;;  %v2903_v5 = vld [vmem:[#allocation5 + $0x514] sm:$0xf0] }
  0x8d   :  { %1435 = vmatpush.bf16.msrb.mxu0 %v1919_v8  ;;  %1449 = vmatpush.bf16.msrb.mxu1 %v2047_v9  ;;  %v2793_v8 = vld [vmem:[#allocation5 + $0x1ac] sm:$0xf]  ;;  %v2096_v9 = vld [vmem:[#allocation5 + $0x1b8] sm:$0xf0] }
  0x8e   :  { %1463 = vmatpush.bf16.msrb.mxu2 %v2175_v10  ;;  %v2479_v10 = vor.u32 %v2891_v1, %v2478_v0  ;;  %v2099_v16 = vor.u32 %v2793_v8, %v2096_v9  ;;  %v2398_v0 = vld [vmem:[#allocation5 + $0x408] sm:$0xf]  ;;  %v2871_v1 = vld [vmem:[#allocation5 + $0x414] sm:$0xf0]  ;;  %v1888_v9 = vld [vmem:[#allocation5 + $0x18] sm:$0xf0] }
  0x8f   :  { %1477 = vmatpush.bf16.msrb.mxu3 %v2303_v14  ;;  %v2887_v14 = vld [vmem:[#allocation5 + $0x494] sm:$0xf0]  ;;  %v2368_v33 = vld [vmem:[#allocation5 + $0x3d8] sm:$0xf0]  ;;  %v2821_v55 = vld [vmem:[#allocation5 + $0x28c] sm:$0xf] }
  0x90   :  { %v2463_v24 = vor.u32 %v2887_v14, %v2462_v13  ;;  %v2256_v13 = vld [vmem:[#allocation5 + $0x2f8] sm:$0xf0]  ;;  %v2865_v14 = vld [vmem:[#allocation5 + $0x3ec] sm:$0xf] }
  0x91   :  { %1436 = vmatpush.bf16.msrb.mxu0 %v1903_v20  ;;  %1450 = vmatpush.bf16.msrb.mxu1 %v2031_v25  ;;  %v2789_v20 = vld [vmem:[#allocation5 + $0x18c] sm:$0xf]  ;;  %v2591_v25 = vor.u32 %v2919_v17, %v2590_v15  ;;  %v2399_v15 = vor.u32 %v2871_v1, %v2398_v0 }
  0x92   :  { %1464 = vmatpush.bf16.msrb.mxu2 %v2159_v26  ;;  %v1955_v26 = vor.u32 %v2757_v18, %v1952_v19  ;;  %v2897_v17 = vld [vmem:[#allocation5 + $0x4ec] sm:$0xf]  ;;  %v2512_v18 = vld [vmem:[#allocation5 + $0x4f8] sm:$0xf0]  ;;  %v2527_v19 = vor.u32 %v2903_v5, %v2526_v4 }
  0x93   :  { %1478 = vmatpush.bf16.msrb.mxu3 %v2287_v30  ;;  %v2083_v30 = vor.u32 %v2789_v20, %v2080_v21  ;;  %v1891_v20 = vor.u32 %v2741_v7, %v1888_v9  ;;  %v2929_v21 = vld [vmem:[#allocation5 + $0x5ec] sm:$0xf]  ;;  %v2515_v28 = vor.u32 %v2897_v17, %v2512_v18  ;;  %v2320_v7 = vld [vmem:[#allocation5 + $0x378] sm:$0xf0] }
  0x94   :  { %v2853_v58 = vld [vmem:[#allocation5 + $0x38c] sm:$0xf]  ;;  %v2448_v9 = vld [vmem:[#allocation5 + $0x478] sm:$0xf0] }
  0x95   :  { %1437 = vmatpush.bf16.msrb.mxu0 %v1887_v38  ;;  %1451 = vmatpush.bf16.msrb.mxu1 %v2015_v43  ;;  %v2575_v38 = vor.u32 %v2915_v31, %v2574_v29  ;;  %v2558_v43 = vld [vmem:[#allocation5 + $0x548] sm:$0xf]  ;;  %v2829_v29 = vld [vmem:[#allocation5 + $0x2cc] sm:$0xf] }
  0x96   :  { %1465 = vmatpush.bf16.msrb.mxu2 %v2143_v44  ;;  %v2067_v44 = vor.u32 %v2785_v34, %v2064_v36  ;;  %v2559_v51 = vor.u32 %v2911_v45, %v2558_v43  ;;  %v2861_v31 = vld [vmem:[#allocation5 + $0x3cc] sm:$0xf]  ;;  %v2496_v36 = vld [vmem:[#allocation5 + $0x4d8] sm:$0xf0] }
  0x97   :  { %1479 = vmatpush.bf16.msrb.mxu3 %v2271_v47  ;;  %v1920_v47 = vld [vmem:[#allocation5 + $0x58] sm:$0xf0]  ;;  %v2893_v34 = vld [vmem:[#allocation5 + $0x4cc] sm:$0xf] }
  0x98   :  { %1438 = vmatmul.bf16.vlgmr.msrb.gmra.mxu0 %v3153_v57  ;;  %1452 = vmatmul.bf16.vlgmr.msrb.gmra.mxu1 %v3156_v6  ;;  %v1923_v52 = vor.u32 %v2749_v46, %v1920_v47  ;;  %v2825_v43 = vld [vmem:[#allocation5 + $0x2ac] sm:$0xf]  ;;  %v2352_v47 = vld [vmem:[#allocation5 + $0x3b8] sm:$0xf0] }
  0x99   :  { %1486 = vmatpush.bf16.msra.mxu0 %v2511_v48  ;;  %1500 = vmatpush.bf16.msra.mxu1 %v2639_v49  ;;  %v2781_v48 = vld [vmem:[#allocation5 + $0x14c] sm:$0xf]  ;;  %v2048_v49 = vld [vmem:[#allocation5 + $0x158] sm:$0xf0] }
  0x9a   :  { %1514 = vmatpush.bf16.msra.mxu2 %v2003_v50  ;;  %1480 = vmatmul.bf16.vlgmr.msrb.gmra.mxu3 %v3161_v23  ;;  %v2431_v50 = vor.u32 %v2879_v42, %v2430_v41  ;;  %v2051_v56 = vor.u32 %v2781_v48, %v2048_v49  ;;  %v2371_v41 = vor.u32 %v2861_v31, %v2368_v33  ;;  %v2857_v45 = vld [vmem:[#allocation5 + $0x3ac] sm:$0xf]  ;;  %v2480_v49 = vld [vmem:[#allocation5 + $0x4b8] sm:$0xf0] }
  0x9b   :  { %1528 = vmatpush.bf16.msra.mxu3 %v2131_v54  ;;  %1466 = vmatmul.bf16.vlgmr.msrb.gmra.mxu2 %v3159_v22  ;;  %v2875_v54 = vld [vmem:[#allocation5 + $0x434] sm:$0xf0]  ;;  %v2499_v42 = vor.u32 %v2893_v34, %v2496_v36  ;;  %v2889_v48 = vld [vmem:[#allocation5 + $0x4ac] sm:$0xf]  ;;  %v2160_v31 = vld [vmem:[#allocation5 + $0x238] sm:$0xf0] }
  0x9c   :  { %v2849_v4 = vld [vmem:[#allocation5 + $0x36c] sm:$0xf]  ;;  %v2288_v34 = vld [vmem:[#allocation5 + $0x338] sm:$0xf0] }
  0x9d   :  { %1487 = vmatpush.bf16.msra.mxu0 %v2495_v61  ;;  %1501 = vmatpush.bf16.msra.mxu1 %v2623_v62  ;;  %v2777_v61 = vld [vmem:[#allocation5 + $0x12c] sm:$0xf]  ;;  %v2032_v62 = vld [vmem:[#allocation5 + $0x138] sm:$0xf0] }
  0x9e   :  { %1515 = vmatpush.bf16.msra.mxu2 %v1987_v63  ;;  %v2415_v63 = vor.u32 %v2875_v54, %v2414_v53  ;;  %v2035_v8 = vor.u32 %v2777_v61, %v2032_v62  ;;  %v2355_v53 = vor.u32 %v2857_v45, %v2352_v47  ;;  %v2483_v54 = vor.u32 %v2889_v48, %v2480_v49  ;;  %v2885_v61 = vld [vmem:[#allocation5 + $0x48c] sm:$0xf]  ;;  %v2464_v62 = vld [vmem:[#allocation5 + $0x498] sm:$0xf0] }
  0x9f   :  { %1529 = vmatpush.bf16.msra.mxu3 %v2115_v3  ;;  %v1907_v3 = vor.u32 %v2745_v59, %v1904_v60  ;;  %v2336_v60 = vld [vmem:[#allocation5 + $0x398] sm:$0xf0]  ;;  %v2845_v17 = vld [vmem:[#allocation5 + $0x34c] sm:$0xf] }
  0xa0   :  { %v2339_v1 = vor.u32 %v2853_v58, %v2336_v60  ;;  %v2873_v36 = vld [vmem:[#allocation5 + $0x42c] sm:$0xf]  ;;  %v2272_v49 = vld [vmem:[#allocation5 + $0x318] sm:$0xf0] }
  0xa1   :  { %1488 = vmatpush.bf16.msra.mxu0 %v2479_v10  ;;  %1502 = vmatpush.bf16.msra.mxu1 %v2607_v11  ;;  %v2773_v10 = vld [vmem:[#allocation5 + $0x10c] sm:$0xf]  ;;  %v2016_v11 = vld [vmem:[#allocation5 + $0x118] sm:$0xf0] }
  0xa2   :  { %1516 = vmatpush.bf16.msra.mxu2 %v1971_v12  ;;  %v2833_v12 = vld [vmem:[#allocation5 + $0x2ec] sm:$0xf]  ;;  %v2939_v60 = vld [vmem:[#allocation8 + $0x38] sm:$0xff] }
  0xa3   :  { %1530 = vmatpush.bf16.msra.mxu3 %v2099_v16  ;;  %v2384_v16 = vld [vmem:[#allocation5 + $0x3f8] sm:$0xf0]  ;;  %v2805_v45 = vld [vmem:[#allocation5 + $0x20c] sm:$0xf] }
  0xa4   :  { %v2387_v27 = vor.u32 %v2865_v14, %v2384_v16  ;;  %v2176_v16 = vld [vmem:[#allocation5 + $0x258] sm:$0xf0]  ;;  %v2837_v47 = vld [vmem:[#allocation5 + $0x30c] sm:$0xf] }
  0xa5   :  { %1489 = vmatpush.bf16.msra.mxu0 %v2463_v24  ;;  %1503 = vmatpush.bf16.msra.mxu1 %v2591_v25  ;;  %v2640_v24 = vld [vmem:[#allocation5 + $0x5f8] sm:$0xf0]  ;;  %v2019_v25 = vor.u32 %v2773_v10, %v2016_v11  ;;  %v2913_v10 = vld [vmem:[#allocation5 + $0x56c] sm:$0xf] }
  0xa6   :  { %1517 = vmatpush.bf16.msra.mxu2 %v1955_v26  ;;  %v2259_v26 = vor.u32 %v2833_v12, %v2256_v13  ;;  %v2643_v32 = vor.u32 %v2929_v21, %v2640_v24  ;;  %v2576_v11 = vld [vmem:[#allocation5 + $0x578] sm:$0xf0]  ;;  %v2323_v13 = vor.u32 %v2849_v4, %v2320_v7  ;;  %v2909_v24 = vld [vmem:[#allocation5 + $0x54c] sm:$0xf] }
  0xa7   :  { %1531 = vmatpush.bf16.msra.mxu3 %v2083_v30  ;;  %v2240_v30 = vld [vmem:[#allocation5 + $0x2d8] sm:$0xf0]  ;;  %v2579_v18 = vor.u32 %v2913_v10, %v2576_v11  ;;  %v2936_v10 = vld [vmem:[#allocation8 + $0x20] sm:$0xff] }
  0xa8   :  { %v2432_v21 = vld [vmem:[#allocation5 + $0x458] sm:$0xf0] }
  0xa9   :  { %1490 = vmatpush.bf16.msra.mxu0 %v2447_v37  ;;  %1504 = vmatpush.bf16.msra.mxu1 %v2575_v38  ;;  %v2925_v37 = vld [vmem:[#allocation5 + $0x5cc] sm:$0xf]  ;;  %v2624_v38 = vld [vmem:[#allocation5 + $0x5d8] sm:$0xf0] }
  0xaa   :  { %1518 = vmatpush.bf16.msra.mxu2 %v1939_v40  ;;  %v2243_v40 = vor.u32 %v2829_v29, %v2240_v30  ;;  %v2627_v46 = vor.u32 %v2925_v37, %v2624_v38  ;;  %v2809_v30 = vld [vmem:[#allocation5 + $0x22c] sm:$0xf]  ;;  %v2416_v37 = vld [vmem:[#allocation5 + $0x438] sm:$0xf0] }
  0xab   :  { %1532 = vmatpush.bf16.msra.mxu3 %v2067_v44  ;;  %v2224_v44 = vld [vmem:[#allocation5 + $0x2b8] sm:$0xf0] }
  0xad   :  { %1491 = vmatpush.bf16.msra.mxu0 %v2431_v50  ;;  %1505 = vmatpush.bf16.msra.mxu1 %v2559_v51  ;;  %v2921_v50 = vld [vmem:[#allocation5 + $0x5ac] sm:$0xf]  ;;  %v2608_v51 = vld [vmem:[#allocation5 + $0x5b8] sm:$0xf0] }
  0xae   :  { %1519 = vmatpush.bf16.msra.mxu2 %v1923_v52  ;;  %v2227_v52 = vor.u32 %v2825_v43, %v2224_v44  ;;  %v2611_v59 = vor.u32 %v2921_v50, %v2608_v51  ;;  %v2419_v44 = vor.u32 %v2873_v36, %v2416_v37  ;;  %v2869_v50 = vld [vmem:[#allocation5 + $0x40c] sm:$0xf]  ;;  %v2400_v51 = vld [vmem:[#allocation5 + $0x418] sm:$0xf0] }
  0xaf   :  { %1533 = vmatpush.bf16.msra.mxu3 %v2051_v56  ;;  %v2208_v56 = vld [vmem:[#allocation5 + $0x298] sm:$0xf0]  ;;  %v2403_v58 = vor.u32 %v2869_v50, %v2400_v51  ;;  %v2953_v50 = vld [vmem:[#allocation8 + $0xa8] sm:$0xff] }
  0xb0   :  { %v2211_v0 = vor.u32 %v2821_v55, %v2208_v56  ;;  %v2275_v56 = vor.u32 %v2837_v47, %v2272_v49 }
  0xb1   :  { %1492 = vmatpush.bf16.msra.mxu0 %v2415_v63  ;;  %1506 = vmatpush.bf16.msra.mxu1 %v2543_v2  ;;  %v2917_v63 = vld [vmem:[#allocation5 + $0x58c] sm:$0xf] }
  0xb2   :  { %1520 = vmatpush.bf16.msra.mxu2 %v1907_v3  ;;  %v2817_v2 = vld [vmem:[#allocation5 + $0x26c] sm:$0xf]  ;;  %v2192_v3 = vld [vmem:[#allocation5 + $0x278] sm:$0xf0] }
  0xb3   :  { %1534 = vmatpush.bf16.msra.mxu3 %v2035_v8  ;;  %v2881_v8 = vld [vmem:[#allocation5 + $0x46c] sm:$0xf]  ;;  %v2195_v12 = vor.u32 %v2817_v2, %v2192_v3 }
  0xb4   :  { %v2451_v14 = vor.u32 %v2881_v8, %v2448_v9  ;;  %v2937_v3 = vld [vmem:[#allocation8 + $0x28] sm:$0xff] }
  0xb5   :  { %1493 = vmatpush.bf16.msra.mxu0 %v2399_v15  ;;  %1507 = vmatpush.bf16.msra.mxu1 %v2527_v19  ;;  %v2813_v15 = vld [vmem:[#allocation5 + $0x24c] sm:$0xf]  ;;  %v2304_v19 = vld [vmem:[#allocation5 + $0x358] sm:$0xf0]  ;;  %v1285_v38 = vpop.f32.mrf.mxu1 }
  0xb6   :  { %1521 = vmatpush.bf16.msra.mxu2 %v1891_v20  ;;  %v2877_v20 = vld [vmem:[#allocation5 + $0x44c] sm:$0xf] }
  0xb7   :  { %1535 = vmatpush.bf16.msra.mxu3 %v2019_v25  ;;  %v2560_v25 = vld [vmem:[#allocation5 + $0x558] sm:$0xf0] }
  0xb8   :  { %1494 = vmatmul.bf16.vlgmr.msra.gmra.mxu0 %v3165_v35  ;;  %1508 = vmatmul.bf16.vlgmr.msra.gmra.mxu1 %v3167_v39  ;;  %v2563_v33 = vor.u32 %v2909_v24, %v2560_v25  ;;  %v2933_v25 = vld [vmem:[#allocation8 + $0x8] sm:$0xff] }
  0xb9   :  { %1542 = vmatpush.bf16.msrb.mxu0 %v2259_v26  ;;  %1556 = vmatpush.bf16.msrb.mxu1 %v2387_v27  ;;  %v2179_v26 = vor.u32 %v2813_v15, %v2176_v16  ;;  %v2307_v27 = vor.u32 %v2845_v17, %v2304_v19  ;;  %v1271_v29 = vpop.f32.mrf.mxu0 }
  0xba   :  { %1570 = vmatpush.bf16.msrb.mxu2 %v2515_v28  ;;  %1536 = vmatmul.bf16.vlgmr.msra.gmra.mxu3 %v3156_v6  ;;  %v2467_v6 = vor.u32 %v2885_v61, %v2464_v62  ;;  %v2435_v28 = vor.u32 %v2877_v20, %v2432_v21 }
  0xbb   :  { %1584 = vmatpush.bf16.msrb.mxu3 %v2643_v32  ;;  %1522 = vmatmul.bf16.vlgmr.msra.gmra.mxu2 %v3153_v57  ;;  %v2592_v57 = vld [vmem:[#allocation5 + $0x598] sm:$0xf0]  ;;  %v2841_v32 = vld [vmem:[#allocation5 + $0x32c] sm:$0xf] }
  0xbc   :  { %v2595_v5 = vor.u32 %v2917_v63, %v2592_v57  ;;  %v2291_v43 = vor.u32 %v2841_v32, %v2288_v34 }
  0xbd   :  { %1543 = vmatpush.bf16.msrb.mxu0 %v2243_v40  ;;  %1557 = vmatpush.bf16.msrb.mxu1 %v2371_v41  ;;  %v2905_v40 = vld [vmem:[#allocation5 + $0x52c] sm:$0xf]  ;;  %v2544_v41 = vld [vmem:[#allocation5 + $0x538] sm:$0xf0]  ;;  %v1313_v57 = vpop.f32.mrf.mxu3 }
  0xbe   :  { %1571 = vmatpush.bf16.msrb.mxu2 %v2499_v42  ;;  %v2163_v42 = vor.u32 %v2809_v30, %v2160_v31  ;;  %v2547_v48 = vor.u32 %v2905_v40, %v2544_v41  ;;  %v2932_v30 = vld [vmem:[#allocation8] sm:$0xff]  ;;  %v2955_v41 = vld [vmem:[#allocation8 + $0xb8] sm:$0xff] }
  0xbf   :  { %1585 = vmatpush.bf16.msrb.mxu3 %v2627_v46  ;;  %v2144_v46 = vld [vmem:[#allocation5 + $0x218] sm:$0xf0] }
  0xc0   :  { %v2147_v55 = vor.u32 %v2805_v45, %v2144_v46 }
  0xc1   :  { %1544 = vmatpush.bf16.msrb.mxu0 %v2227_v52  ;;  %1558 = vmatpush.bf16.msrb.mxu1 %v2355_v53  ;;  %v2901_v52 = vld [vmem:[#allocation5 + $0x50c] sm:$0xf]  ;;  %v2528_v53 = vld [vmem:[#allocation5 + $0x518] sm:$0xf0]  ;;  %v1273_v63 = vpop.f32.mrf.mxu0 }
  0xc2   :  { %1572 = vmatpush.bf16.msrb.mxu2 %v2483_v54  ;;  %v3185_v54 = vld [vmem:[#allocation7] sm:$0xf] }
  0xc3   :  { %1586 = vmatpush.bf16.msrb.mxu3 %v2611_v59  ;;  %v2531_v59 = vor.u32 %v2901_v52, %v2528_v53  ;;  %v294_v62 = vperm.slane %v3185_v54, 0  ;;  %v2952_v53 = vld [vmem:[#allocation8 + $0xa0] sm:$0xff] }
  0xc5   :  { %1545 = vmatpush.bf16.msrb.mxu0 %v2211_v0  ;;  %1559 = vmatpush.bf16.msrb.mxu1 %v2339_v1  ;;  %v1287_v0 = vpop.f32.mrf.mxu1  ;;  %v2938_v1 = vld [vmem:[#allocation8 + $0x30] sm:$0xff]  ;;  %v1274_v2 = vadd.f32 %v1273_v63, %v294_v62  ;;  %v1315_v9 = vpop.f32.mrf.mxu3  ;;  %v296_v63 = vperm.slane %v3185_v54, 2 }
  0xc6   :  { %1573 = vmatpush.bf16.msrb.mxu2 %v2467_v6  ;;  %v1299_v61 = vpop.f32.mrf.mxu2  ;;  %v1272_v6 = vadd.f32 %v1271_v29, %v294_v62  ;;  %v2948_v62 = vld [vmem:[#allocation8 + $0x80] sm:$0xff] }
  0xc7   :  { %1587 = vmatpush.bf16.msrb.mxu3 %v2595_v5  ;;  %v1288_v5 = vadd.f32 %v1287_v0, %v1274_v2  ;;  %v2947_v0 = vld [vmem:[#allocation8 + $0x78] sm:$0xff]  ;;  %v2946_v2 = vld [vmem:[#allocation8 + $0x70] sm:$0xff] }
  0xc8   :  { %v1286_v4 = vadd.f32 %v1285_v38, %v1272_v6 }
  0xc9   :  { %1546 = vmatpush.bf16.msrb.mxu0 %v2195_v12  ;;  %1560 = vmatpush.bf16.msrb.mxu1 %v2323_v13 }
  0xca   :  { %1574 = vmatpush.bf16.msrb.mxu2 %v2451_v14  ;;  %v1300_v12 = vadd.f32 %v1299_v61, %v1286_v4 }
  0xcb   :  { %1588 = vmatpush.bf16.msrb.mxu3 %v2579_v18  ;;  %v2934_v18 = vld [vmem:[#allocation8 + $0x10] sm:$0xff] }
  0xcc   :  { %v1314_v14 = vadd.f32 %v1313_v57, %v1300_v12 }
  0xcd   :  { %1547 = vmatpush.bf16.msrb.mxu0 %v2179_v26  ;;  %1561 = vmatpush.bf16.msrb.mxu1 %v2307_v27 }
  0xce   :  { %1575 = vmatpush.bf16.msrb.mxu2 %v2435_v28  ;;  %v1301_v7 = vpop.f32.mrf.mxu2 }
  0xcf   :  { %1589 = vmatpush.bf16.msrb.mxu3 %v2563_v33  ;;  %v1302_v13 = vadd.f32 %v1301_v7, %v1288_v5 }
  0xd1   :  { %1548 = vmatpush.bf16.msrb.mxu0 %v2163_v42  ;;  %1562 = vmatpush.bf16.msrb.mxu1 %v2291_v43  ;;  %v2954_v43 = vld [vmem:[#allocation8 + $0xb0] sm:$0xff] }
  0xd2   :  { %1576 = vmatpush.bf16.msrb.mxu2 %v2419_v44 }
  0xd3   :  { %1590 = vmatpush.bf16.msrb.mxu3 %v2547_v48 }
  0xd5   :  { %1549 = vmatpush.bf16.msrb.mxu0 %v2147_v55  ;;  %1563 = vmatpush.bf16.msrb.mxu1 %v2275_v56  ;;  %v1327_v8 = vpop.f32.mrf.mxu0  ;;  %v1341_v11 = vpop.f32.mrf.mxu1  ;;  %v2951_v55 = vld [vmem:[#allocation8 + $0x98] sm:$0xff]  ;;  %v2950_v56 = vld [vmem:[#allocation8 + $0x90] sm:$0xff] }
  0xd6   :  { %1577 = vmatpush.bf16.msrb.mxu2 %v2403_v58  ;;  %v1328_v19 = vadd.f32 %v1327_v8, %v1314_v14  ;;  %v2949_v58 = vld [vmem:[#allocation8 + $0x88] sm:$0xff] }
  0xd7   :  { %1591 = vmatpush.bf16.msrb.mxu3 %v2531_v59 }
  0xd8   :  { %1550 = vmatmul.bf16.vlgmr.msrb.gmra.mxu0 %v3159_v22  ;;  %1564 = vmatmul.bf16.vlgmr.msrb.gmra.mxu1 %v3161_v23  ;;  %v295_v22 = vperm.slane %v3185_v54, 1  ;;  %v2935_v23 = vld [vmem:[#allocation8 + $0x18] sm:$0xff]  ;;  %v1342_v26 = vadd.f32 %v1341_v11, %v1328_v19 }
  0xd9   :  { %1768 = vmatpush.bf16.msra.mxu1 %v2939_v60  ;;  %1578 = vmatmul.bf16.vlgmr.msrb.gmra.mxu2 %v3165_v35  ;;  %v1316_v35 = vadd.f32 %v1315_v9, %v1302_v13  ;;  %v2945_v13 = vld [vmem:[#allocation8 + $0x68] sm:$0xff] }
  0xda   :  { %1592 = vmatmul.bf16.vlgmr.msrb.gmra.mxu3 %v3167_v39  ;;  %v1598_v32 = vmax.f32 %v1342_v26, 0.0  ;;  %1831 = vmatpush.bf16.msra.mxu2 %v2955_v41  ;;  %v2942_v26 = vld [vmem:[#allocation8 + $0x50] sm:$0xff] }
  0xdb   :  { %1706 = vmatpush.bf16.msra.mxu0 %v2947_v0 }
  0xdd   :  { %1769 = vmatpush.bf16.msra.mxu1 %v2938_v1  ;;  %v1329_v39 = vpop.f32.mrf.mxu0  ;;  %v1369_v17 = vpop.f32.mrf.mxu3 }
  0xde   :  { %v1355_v15 = vpop.f32.mrf.mxu2  ;;  %v1330_v20 = vadd.f32 %v1329_v39, %v1316_v35  ;;  %v1343_v24 = vpop.f32.mrf.mxu1  ;;  %1832 = vmatpush.bf16.msra.mxu2 %v2954_v43  ;;  %v2944_v39 = vld [vmem:[#allocation8 + $0x60] sm:$0xff] }
  0xdf   :  { %v1356_v16 = vadd.f32 %v1355_v15, %v295_v22  ;;  %1707 = vmatpush.bf16.msra.mxu0 %v2946_v2 }
  0xe0   :  { %v1344_v27 = vadd.f32 %v1343_v24, %v1330_v20 }
  0xe1   :  { %1770 = vmatpush.bf16.msra.mxu1 %v2937_v3  ;;  %v1370_v21 = vadd.f32 %v1369_v17, %v1356_v16 }
  0xe2   :  { %v1602_v33 = vmax.f32 %v1344_v27, 0.0  ;;  %1833 = vmatpush.bf16.msra.mxu2 %v2953_v50 }
  0xe3   :  { %1708 = vmatpush.bf16.msra.mxu0 %v2945_v13 }
  0xe4   :  { %v1656_v36 = vpack.c.bf16 %v1602_v33, %v1598_v32  ;;  %v2940_v32 = vld [vmem:[#allocation8 + $0x40] sm:$0xff]  ;;  %v297_v33 = vperm.slane %v3185_v54, 3 }
  0xe5   :  { %1771 = vmatpush.bf16.msra.mxu1 %v2936_v10  ;;  %v1371_v31 = vpop.f32.mrf.mxu3 }
  0xe6   :  { %v1357_v28 = vpop.f32.mrf.mxu2  ;;  %1834 = vmatpush.bf16.msra.mxu2 %v2952_v53 }
  0xe7   :  { %v1358_v29 = vadd.f32 %v1357_v28, %v295_v22  ;;  %1709 = vmatpush.bf16.msra.mxu0 %v2944_v39 }
  0xe9   :  { %1772 = vmatpush.bf16.msra.mxu1 %v2935_v23  ;;  %v1372_v34 = vadd.f32 %v1371_v31, %v1358_v29  ;;  %v2941_v29 = vld [vmem:[#allocation8 + $0x48] sm:$0xff] }
  0xea   :  { %1835 = vmatpush.bf16.msra.mxu2 %v2951_v55 }
  0xed   :  { %1773 = vmatpush.bf16.msra.mxu1 %v2934_v18  ;;  %v2943_v18 = vld [vmem:[#allocation8 + $0x58] sm:$0xff] }
  0xee   :  { %1836 = vmatpush.bf16.msra.mxu2 %v2950_v56  ;;  %1710 = vmatpush.bf16.msra.mxu0 %v2943_v18 }
  0xf1   :  { %1774 = vmatpush.bf16.msra.mxu1 %v2933_v25 }
  0xf2   :  { %1837 = vmatpush.bf16.msra.mxu2 %v2949_v58  ;;  %1711 = vmatpush.bf16.msra.mxu0 %v2942_v26 }
  0xf5   :  { %1775 = vmatpush.bf16.msra.mxu1 %v2932_v30  ;;  %v1383_v37 = vpop.f32.mrf.mxu0  ;;  %v1397_v40 = vpop.f32.mrf.mxu1 }
  0xf6   :  { %v1384_v38 = vadd.f32 %v1383_v37, %v1370_v21  ;;  %1838 = vmatpush.bf16.msra.mxu2 %v2948_v62  ;;  %1712 = vmatpush.bf16.msra.mxu0 %v2941_v29 }
  0xf8   :  { %1776 = vmatmul.bf16.vlgmr.msra.gmra.mxu1 %v1656_v36  ;;  %v1398_v42 = vadd.f32 %v1397_v40, %v1384_v38 }
  0xfa   :  { %1713 = vmatpush.bf16.msra.mxu0 %v2940_v32 }
  0xfd   :  { %v1385_v46 = vpop.f32.mrf.mxu0  ;;  %v1425_v48 = vpop.f32.mrf.mxu3 }
  0xfe   :  { %v1411_v44 = vpop.f32.mrf.mxu2  ;;  %v1386_v47 = vadd.f32 %v1385_v46, %v1372_v34  ;;  %v1399_v49 = vpop.f32.mrf.mxu1 }
  0xff   :  { %v1412_v45 = vadd.f32 %v1411_v44, %v1398_v42 }
 0x100   :  { %v3195_v52 = vadd.f32 %v1399_v49, %v1386_v47 }
 0x101   :  { %v3193_v51 = vadd.f32 %v1425_v48, %v1412_v45 }
 0x105   :  { %v3200_v57 = vpop.f32.mrf.mxu3 }
 0x106   :  { %v3197_v59 = vpop.f32.mrf.mxu2 }
 0x107   :  { %v1414_v53 = vadd.f32 %v3197_v59, %v3195_v52 }
 0x115   :  { %v1439_v60 = vpop.f32.mrf.mxu0  ;;  %v1453_v61 = vpop.f32.mrf.mxu1 }
 0x116   :  { %v1440_v1 = vadd.f32 %v1439_v60, %v296_v63  ;;  %v1428_v60 = vadd.f32 %v3200_v57, %v1414_v53  ;;  %v2969_v57 = vld [vmem:[%s3217_s4] ss:$0 sm:$0xff]  ;;  %s3110_s4 = smov 8  }
 0x118   :  { %v1454_v4 = vadd.f32 %v1453_v61, %v1440_v1  ;;  %v1599_v1 = vmax.f32 %v3193_v51, 0.0 }
 0x11d   :  { %v1441_v3 = vpop.f32.mrf.mxu0  ;;  %v1455_v5 = vpop.f32.mrf.mxu1 }
 0x11e   :  { %v1467_v6 = vpop.f32.mrf.mxu2  ;;  %v1481_v7 = vpop.f32.mrf.mxu3  ;;  %v1442_v8 = vadd.f32 %v1441_v3, %v296_v63 }
 0x11f   :  { %v1468_v9 = vadd.f32 %v1467_v6, %v1454_v4  ;;  %v1603_v6 = vmax.f32 %v1428_v60, 0.0 }
 0x120   :  { %v1456_v10 = vadd.f32 %v1455_v5, %v1442_v8 }
 0x121   :  { %v1482_v12 = vadd.f32 %v1481_v7, %v1468_v9 }
 0x126   :  { %v1469_v11 = vpop.f32.mrf.mxu2  ;;  %v1483_v35 = vpop.f32.mrf.mxu3 }
 0x127   :  { %v1470_v14 = vadd.f32 %v1469_v11, %v1456_v10 }
 0x129   :  { %v1484_v16 = vadd.f32 %v1483_v35, %v1470_v14 }
 0x135   :  { %v1495_v22 = vpop.f32.mrf.mxu0  ;;  %v1509_v23 = vpop.f32.mrf.mxu1 }
 0x136   :  { %v1496_v15 = vadd.f32 %v1495_v22, %v1482_v12 }
 0x138   :  { %v1510_v17 = vadd.f32 %v1509_v23, %v1496_v15 }
 0x13a   :  { %v1600_v24 = vmax.f32 %v1510_v17, 0.0 }
 0x13d   :  { %v1497_v19 = vpop.f32.mrf.mxu0  ;;  %v1511_v21 = vpop.f32.mrf.mxu1 }
 0x13e   :  { %v1498_v20 = vadd.f32 %v1497_v19, %v1484_v16  ;;  %v1523_v30 = vpop.f32.mrf.mxu2  ;;  %v1537_v31 = vpop.f32.mrf.mxu3 }
 0x13f   :  { %v1524_v34 = vadd.f32 %v1523_v30, %v297_v33 }
 0x140   :  { %v1512_v25 = vadd.f32 %v1511_v21, %v1498_v20 }
 0x141   :  { %v1538_v40 = vadd.f32 %v1537_v31, %v1524_v34 }
 0x142   :  { %v1604_v27 = vmax.f32 %v1512_v25, 0.0 }
 0x144   :  { %v1782_v28 = vpack.c.bf16 %v1604_v27, %v1600_v24 }
 0x146   :  { %1839 = vmatmul.bf16.vlgmr.msra.gmra.mxu2 %v1782_v28  ;;  %v1525_v36 = vpop.f32.mrf.mxu2  ;;  %v1539_v37 = vpop.f32.mrf.mxu3 }
 0x147   :  { %v1526_v42 = vadd.f32 %v1525_v36, %v297_v33 }
 0x149   :  { %v1540_v45 = vadd.f32 %v1539_v37, %v1526_v42 }
 0x155   :  { %v1551_v38 = vpop.f32.mrf.mxu0  ;;  %v1565_v41 = vpop.f32.mrf.mxu1 }
 0x156   :  { %v1552_v43 = vadd.f32 %v1551_v38, %v1538_v40 }
 0x158   :  { %v1566_v46 = vadd.f32 %v1565_v41, %v1552_v43 }
 0x15c   :  { %v1579_v44 = vpop.f32.mrf.mxu2 }
 0x15d   :  { %v1593_v47 = vpop.f32.mrf.mxu3  ;;  %v1553_v48 = vpop.f32.mrf.mxu0  ;;  %v1580_v49 = vadd.f32 %v1579_v44, %v1566_v46 }
 0x15e   :  { %v1554_v50 = vadd.f32 %v1553_v48, %v1540_v45  ;;  %v1567_v55 = vpop.f32.mrf.mxu1 }
 0x15f   :  { %v1594_v54 = vadd.f32 %v1593_v47, %v1580_v49 }
 0x160   :  { %v1568_v56 = vadd.f32 %v1567_v55, %v1554_v50 }
 0x161   :  { %v1601_v63 = vmax.f32 %v1594_v54, 0.0 }
 0x163   :  { %v1606_v3 = vmax.f32 %v1599_v1, %v1601_v63 }
 0x164   :  { %v1581_v58 = vpop.f32.mrf.mxu2 }
 0x165   :  { %v1582_v61 = vadd.f32 %v1581_v58, %v1568_v56  ;;  %v1595_v62 = vpop.f32.mrf.mxu3 }
 0x167   :  { %v1596_v0 = vadd.f32 %v1595_v62, %v1582_v61 }
 0x169   :  { %v1605_v2 = vmax.f32 %v1596_v0, 0.0 }
 0x16b   :  { %v1607_v4 = vmax.f32 %v1603_v6, %v1605_v2 }
 0x16d   :  { %v1657_v5 = vpack.c.bf16 %v1607_v4, %v1606_v3 }
 0x16f   :  { %1714 = vmatmul.bf16.vlgmr.msra.gmra.mxu0 %v1657_v5 }
 0x175   :  { %v1777_v7 = vpop.f32.mrf.mxu1 }
 0x17d   :  { %v1779_v11 = vpop.f32.mrf.mxu1 }
 0x1c9   :  { %v1840_v52 = vpop.f32.mrf.mxu2 }
 0x1d1   :  { %v1842_v13 = vpop.f32.mrf.mxu2 }
 0x1ec   :  { %v1715_v59 = vpop.f32.mrf.mxu0 }
 0x1ed   :  { %v1778_v8 = vadd.f32 %v1777_v7, %v1715_v59 }
 0x1ef   :  { %v1845_v9 = vadd.f32 %v1840_v52, %v1778_v8 }
 0x1f1   :  { %v1851_v10 = vadd.f32 %v2969_v57, %v1845_v9 }
 0x1f3   :  { %1853 = vst [vmem:[#allocation10] sm:$0xff] %v1851_v10 }
 0x1f4   :  { %v1717_v12 = vpop.f32.mrf.mxu0 }
 0x1f5   :  { %v1780_v51 = vadd.f32 %v1779_v11, %v1717_v12 }
 0x1f7   :  { %v1846_v22 = vadd.f32 %v1842_v13, %v1780_v51 }
 0x1f9   :  { %v1852_v23 = vadd.f32 %v2969_v57, %v1846_v22 }
 0x1fb   :  { %1854 = vst [vmem:[#allocation10 + $0x8] sm:$0xff] %v1852_v23 }
 0x1fc   :  { %1867 = dma.vmem_to_hbm [thread:$0]  %s1860_s18, 256, %s1862_s21, [#allocation4], %s3109_s22, %s3109_s22, %s3110_s4  }
 0x1fd   :  { %3096 = dma.done.wait [#allocation4], 256  }
 0x1fe   :  { %3097 = vsyncadd [#allocation4], 4294967040 }
 0x1ff   :  { %1872 = vsyncpa [#allocation3], 1 }
 0x200   :  { %1873 = vsyncpa [#allocation6], 1 }
 0x201   :  { %1874 = vsyncpa [#allocation9], 1 }
 0x202   :  { %1875 = vsyncpa [#allocation4], 1 }

</bundles_post_ra>
